<compile_context>
chip_gen: v7x
topology: tpu7x:2x2x1
jax: 0.10.0
libtpu: 0.0.40
codegen_flags: <defaults>
</compile_context>

<pallas_src>
import jax
import jax.numpy as jnp
from jax import lax
from jax.experimental import pallas as pl
from jax.experimental.pallas import tpu as pltpu

# ----------------------------- configuration ------------------------------
NODES = 16
DIM = 32                 # node embedding dim
HEADS = 4
HEAD_DIM = 8
D = HEADS * HEAD_DIM     # 32
TIME_STEP = 8
TIME_LENGTH = TIME_STEP + 1   # is_add1=True
IN_DIM = 2
BATCH = 2
M_EMA = 0.9
EPS = 1e-5
F_IN = IN_DIM * TIME_LENGTH   # flattened conv receptive field (18)
F_PAD = 24                    # padded to a multiple of 8 sublanes

# row offsets inside the packed [PACK_ROWS, DIM] weight slab (all multiples of 8)
ROW_WC = 0            # 24 rows  (F_IN=18 used, rest zero)
ROW_BC = 24           # 8 rows   (1 used)
ROW_NVS = 32          # 16 rows  nodevec_static (embed1)
ROW_NVD = 48          # 16 rows  nodevec_dy (EMA embed2)
ROW_GW = 64           # 32 rows  gate W
ROW_GT = 96           # 32 rows  gate T
ROW_W = 128           # 16 rows  Graph_learn.w
ROW_WQ = 144          # 32 rows  Wq (head-mix + scale folded in)
ROW_BQ = 176          # 8 rows   (1 used)
ROW_WK = 184          # 32 rows  Wk
ROW_BK = 216          # 8 rows   (1 used)
PACK_ROWS = 224


# ----------------------------- kernel helpers ------------------------------
def _lnorm(x):
    # nn.LayerNorm over last axis, default affine (gamma=1, beta=0), eps=1e-5.
    # var = E[x^2] - E[x]^2 keeps the two cross-lane reductions independent.
    mean = jnp.mean(x, axis=-1, keepdims=True)
    msq = jnp.mean(x * x, axis=-1, keepdims=True)
    var = msq - mean * mean
    return (x - mean) * lax.rsqrt(var + EPS)


def _softmax_last(x):
    m = jnp.max(x, axis=-1, keepdims=True)
    e = jnp.exp(x - m)
    return e * pl.reciprocal(jnp.sum(e, axis=-1, keepdims=True), approx=True)


def _dot_t(a, b):
    # a @ b.T without an explicit XLU transpose: contract the last axes.
    return lax.dot_general(a, b, (((1,), (1,)), ((), ())),
                           preferred_element_type=jnp.float32)


# ------------------------------ fused kernel --------------------------------
def fused_kernel(xf_ref, pk_ref, nn_ref, adj_dyn_ref, adj_static_ref):
    # ---- unpack weights: static, 8-aligned VMEM slices of the packed slab ----
    wc = pk_ref[ROW_WC:ROW_WC + F_PAD, :]          # [24, 32]
    bc = pk_ref[ROW_BC:ROW_BC + 1, :]              # [1, 32]
    nvs = pk_ref[ROW_NVS:ROW_NVS + NODES, :]       # [16, 32]
    nvd = pk_ref[ROW_NVD:ROW_NVD + NODES, :]       # [16, 32]
    gw = pk_ref[ROW_GW:ROW_GW + DIM, :]            # [32, 32]
    gt = pk_ref[ROW_GT:ROW_GT + DIM, :]            # [32, 32]
    w = pk_ref[ROW_W:ROW_W + NODES, :]             # [16, 32]
    wq = pk_ref[ROW_WQ:ROW_WQ + DIM, :]            # [32, 32] (c & scale folded)
    bq = pk_ref[ROW_BQ:ROW_BQ + 1, :]              # [1, 32]
    wk = pk_ref[ROW_WK:ROW_WK + DIM, :]            # [32, 32]
    bk = pk_ref[ROW_BK:ROW_BK + 1, :]              # [1, 32]
    al = nn_ref[0:NODES, :]                        # attn_linear   [16, 16]
    al1 = nn_ref[NODES:2 * NODES, :]               # attn_linear_1 [16, 16]

    # ---- static graph (recomputed per grid step; trivially cheap, keeps the
    #      batch grid fully parallel across TensorCores on v7x) ---------------
    rs = _dot_t(nvs, nvs)                                        # nvs @ nvs^T
    adj_static_ref[0] = _softmax_last(jnp.maximum(_lnorm(rs), 0.0))
    sgi = _lnorm(_dot_t(nvd, nvd))                               # static_graph_inf

    # ---- trans_Merge_line (Conv2d as matmul) + time_norm --------------------
    xf = xf_ref[0]                                               # [N, F_PAD]
    node_input = _lnorm(
        jnp.dot(xf, wc, preferred_element_type=jnp.float32) + bc)   # [N, DIM]

    # ---- gatedFusion_1 (canonical) + residual with static embedding ---------
    z = jax.nn.sigmoid(
        jnp.dot(nvs, gw, preferred_element_type=jnp.float32)
        + jnp.dot(node_input, gt, preferred_element_type=jnp.float32))
    nodevec_fusion = z * nvs + (1.0 - z) * node_input + nvs

    # ---- Graph_learn ---------------------------------------------------------
    nf = _lnorm(nodevec_fusion)                                  # self.bn

    # einsum('bnd,nl->bnl', nf, w) == (sum_d nf[n,d]) * w[n,l]
    nodevec1_1 = jnp.sum(nf, axis=-1, keepdims=True) * w + nf
    skip_atten = _lnorm(_dot_t(nodevec1_1, nodevec1_1))

    # multi-head attention + 1x1-conv head mixing collapsed into one matmul:
    # sum_h[(mlp(A)+A)_h] == (q * c) @ k^T * scale (+ const dropped under the
    # following LayerNorm); c and scale already folded into wq / bq.
    q = jnp.dot(nf, wq, preferred_element_type=jnp.float32) + bq     # [N, D]
    k = jnp.dot(nf, wk, preferred_element_type=jnp.float32) + bk     # [N, D]
    adj_sum = _dot_t(q, k)                                           # [N, N]

    adj_bf = _lnorm(adj_sum) + skip_atten
    adj_af = jnp.maximum(
        jnp.dot(_lnorm(adj_bf), al, preferred_element_type=jnp.float32), 0.0)
    adj_af = jnp.dot(adj_af, al1, preferred_element_type=jnp.float32)
    dy_adj_inf = _lnorm(adj_af + adj_bf)                         # dropout = id
    dy_adj = _lnorm(dy_adj_inf + sgi)
    adj_dyn_ref[0] = _softmax_last(jnp.maximum(dy_adj, 0.0))


# ------------------------------ wrapper --------------------------------------
def _fused_call(xf, packed, packed_nn):
    B = xf.shape[0]
    return pl.pallas_call(
        fused_kernel,
        grid=(B,),
        in_specs=[
            pl.BlockSpec((1, NODES, F_PAD), lambda b: (b, 0, 0)),      # xf
            pl.BlockSpec((PACK_ROWS, DIM), lambda b: (0, 0)),          # packed weights
            pl.BlockSpec((2 * NODES, NODES), lambda b: (0, 0)),        # attn_linear(_1)
        ],
        out_specs=(pl.BlockSpec((1, NODES, NODES), lambda b: (b, 0, 0)),
                   pl.BlockSpec((1, NODES, NODES), lambda b: (b, 0, 0))),
        out_shape=(jax.ShapeDtypeStruct((B, NODES, NODES), jnp.float32),
                   jax.ShapeDtypeStruct((B, NODES, NODES), jnp.float32)),
        compiler_params=pltpu.CompilerParams(
            dimension_semantics=("parallel",)),
        cost_estimate=pl.CostEstimate(flops=600_000, transcendentals=4_000,
                                      bytes_accessed=40_000),
    )(xf, packed, packed_nn)


@jax.jit
def graph_constructor_forward(x, params):
    """x: [B, in_dim, nodes, time_length] (PyTorch NCHW)."""
    embed1 = params["embed1"]
    # momentum update of the frozen embedding (functional)
    embed2 = params["embed2"] * M_EMA + embed1 * (1.0 - M_EMA)
    nodevec_static = embed1

    B = x.shape[0]
    # flatten NCHW conv input -> [B, nodes, in_dim*time_length], pad to F_PAD
    xf = jnp.transpose(x, (0, 2, 1, 3)).reshape(B, NODES, F_IN)
    xf = jnp.pad(xf, ((0, 0), (0, 0), (0, F_PAD - F_IN)))

    # conv weight [dim, in_dim, 1, time_length] -> [in_dim*time_length, dim]
    wc = jnp.pad(params["conv_w"].reshape(DIM, F_IN).T,
                 ((0, F_PAD - F_IN), (0, 0)))
    bc = params["conv_b"].reshape(1, DIM)

    # fold the per-head 1x1-conv mixing and 1/sqrt(head_dim) into Wq / bq:
    #   c[h] = 1 + sum_h' wm[h', h]; the mlp-bias sum is a per-row constant and
    #   cancels inside the subsequent LayerNorm, so it is dropped.
    c = 1.0 + jnp.sum(params["mlp_w"], axis=0)                    # [HEADS]
    c = jnp.repeat(c, HEAD_DIM) * (HEAD_DIM ** -0.5)              # [D]
    wq_eff = params["wq"] * c[None, :]
    bq_eff = params["bq"] * c[None, :]

    def pad_rows(a, rows):
        return jnp.pad(a, ((0, rows - a.shape[0]), (0, 0)))

    packed = jnp.concatenate([
        wc,                          # rows   0..23
        pad_rows(bc, 8),             # rows  24..31
        nodevec_static,              # rows  32..47
        embed2,                      # rows  48..63
        params["gate_w"],            # rows  64..95
        params["gate_t"],            # rows  96..127
        params["w"],                 # rows 128..143
        wq_eff,                      # rows 144..175
        pad_rows(bq_eff, 8),         # rows 176..183
        params["wk"],                # rows 184..215
        pad_rows(params["bk"], 8),   # rows 216..223
    ], axis=0)                       # [224, 32]

    packed_nn = jnp.concatenate(
        [params["attn_linear"], params["attn_linear_1"]], axis=0)  # [32, 16]

    adj_dynamic, adj_static = _fused_call(xf, packed, packed_nn)
    # eval mode: gl_loss is None
    return adj_dynamic, adj_static, nodevec_static, None


# ---------------------------- parameter setup --------------------------------
def _xavier(key, shape, gain=1.414):
    fan_in, fan_out = shape[0], shape[-1]
    limit = gain * (6.0 / (fan_in + fan_out)) ** 0.5
    return jax.random.uniform(key, shape, jnp.float32, -limit, limit)


def init_params(key):
    ks = jax.random.split(key, 12)
    embed1 = jax.random.normal(ks[0], (NODES, DIM), jnp.float32)
    params = dict(
        embed1=embed1,
        embed2=embed1,                                                 # copied at init
        conv_w=_xavier(ks[1], (DIM, IN_DIM, 1, TIME_LENGTH), gain=1.0).reshape(
            DIM, IN_DIM, 1, TIME_LENGTH),
        conv_b=0.01 * jax.random.normal(ks[2], (DIM,), jnp.float32),
        gate_w=_xavier(ks[3], (DIM, DIM)),
        gate_t=_xavier(ks[4], (DIM, DIM)),
        w=_xavier(ks[5], (NODES, DIM)),
        wq=_xavier(ks[6], (DIM, D)),
        bq=0.01 * jax.random.normal(ks[7], (1, D), jnp.float32),
        wk=_xavier(ks[8], (DIM, D)),
        bk=0.01 * jax.random.normal(ks[9], (1, D), jnp.float32),
        attn_linear=_xavier(ks[10], (NODES, NODES)),
        attn_linear_1=_xavier(ks[11], (NODES, NODES)),
        mlp_w=_xavier(jax.random.fold_in(key, 100), (HEADS, HEADS), gain=1.0),
        # mlp_b provably cancels under the attn_norm LayerNorm -> not consumed.
        mlp_b=0.01 * jax.random.normal(jax.random.fold_in(key, 101), (HEADS,), jnp.float32),
    )
    return params


# --------------------------------- main ---------------------------------------
if __name__ == "__main__":
    key = jax.random.PRNGKey(0)
    params = init_params(key)
    x = jax.random.normal(jax.random.fold_in(key, 7),
                          (BATCH, IN_DIM, NODES, TIME_LENGTH), jnp.float32)

    adj_dynamic, adj_static, node_original, gl_loss = graph_constructor_forward(x, params)
    jax.block_until_ready((adj_dynamic, adj_static, node_original))

    assert adj_dynamic.shape == (BATCH, NODES, NODES)
    assert adj_static.shape == (BATCH, NODES, NODES)
    assert node_original.shape == (NODES, DIM)
    assert gl_loss is None
    assert bool(jnp.all(jnp.isfinite(adj_dynamic)))
    assert bool(jnp.all(jnp.isfinite(adj_static)))
    # softmax rows sum to 1 (approx reciprocal in-kernel -> slightly relaxed tol)
    assert bool(jnp.allclose(jnp.sum(adj_dynamic, axis=-1), 1.0, atol=5e-3))
    assert bool(jnp.allclose(jnp.sum(adj_static, axis=-1), 1.0, atol=5e-3))

    print("KERNEL_OK")
</pallas_src>

<mosaic_0001>
module attributes {stable_mosaic.version = 11 : i64} {
  func.func @fused_kernel(%arg0: i32, %arg1: memref<1x16x24xf32, #tpu.memory_space<vmem>>, %arg2: memref<224x32xf32, #tpu.memory_space<vmem>>, %arg3: memref<32x16xf32, #tpu.memory_space<vmem>>, %arg4: memref<1x16x16xf32, #tpu.memory_space<vmem>>, %arg5: memref<1x16x16xf32, #tpu.memory_space<vmem>>) attributes {dimension_semantics = [#tpu.dimension_semantics<parallel>], iteration_bounds = array<i64: 2>, scalar_prefetch = 0 : i64, scratch_operands = 0 : i64, tpu.core_type = #tpu.core_type<tc>, window_params = [{transform_indices = @transform_0, window_bounds = array<i64: 1, 16, 24>}, {pipeline_mode = #tpu.pipeline_mode<synchronous>, transform_indices = @transform_1, window_bounds = array<i64: 224, 32>}, {pipeline_mode = #tpu.pipeline_mode<synchronous>, transform_indices = @transform_2, window_bounds = array<i64: 32, 16>}, {transform_indices = @transform_3, window_bounds = array<i64: 1, 16, 16>}, {transform_indices = @transform_4, window_bounds = array<i64: 1, 16, 16>}]} {
    %c0 = arith.constant 0 : index
    %c0_0 = arith.constant 0 : index
    %0 = vector.load %arg2[%c0, %c0_0] : memref<224x32xf32, #tpu.memory_space<vmem>>, vector<24x32xf32>
    %c24 = arith.constant 24 : index
    %c0_1 = arith.constant 0 : index
    %1 = vector.load %arg2[%c24, %c0_1] : memref<224x32xf32, #tpu.memory_space<vmem>>, vector<1x32xf32>
    %c32 = arith.constant 32 : index
    %c0_2 = arith.constant 0 : index
    %2 = vector.load %arg2[%c32, %c0_2] : memref<224x32xf32, #tpu.memory_space<vmem>>, vector<16x32xf32>
    %c48 = arith.constant 48 : index
    %c0_3 = arith.constant 0 : index
    %3 = vector.load %arg2[%c48, %c0_3] : memref<224x32xf32, #tpu.memory_space<vmem>>, vector<16x32xf32>
    %c64 = arith.constant 64 : index
    %c0_4 = arith.constant 0 : index
    %4 = vector.load %arg2[%c64, %c0_4] : memref<224x32xf32, #tpu.memory_space<vmem>>, vector<32x32xf32>
    %c96 = arith.constant 96 : index
    %c0_5 = arith.constant 0 : index
    %5 = vector.load %arg2[%c96, %c0_5] : memref<224x32xf32, #tpu.memory_space<vmem>>, vector<32x32xf32>
    %c128 = arith.constant 128 : index
    %c0_6 = arith.constant 0 : index
    %6 = vector.load %arg2[%c128, %c0_6] : memref<224x32xf32, #tpu.memory_space<vmem>>, vector<16x32xf32>
    %c144 = arith.constant 144 : index
    %c0_7 = arith.constant 0 : index
    %7 = vector.load %arg2[%c144, %c0_7] : memref<224x32xf32, #tpu.memory_space<vmem>>, vector<32x32xf32>
    %c176 = arith.constant 176 : index
    %c0_8 = arith.constant 0 : index
    %8 = vector.load %arg2[%c176, %c0_8] : memref<224x32xf32, #tpu.memory_space<vmem>>, vector<1x32xf32>
    %c184 = arith.constant 184 : index
    %c0_9 = arith.constant 0 : index
    %9 = vector.load %arg2[%c184, %c0_9] : memref<224x32xf32, #tpu.memory_space<vmem>>, vector<32x32xf32>
    %c216 = arith.constant 216 : index
    %c0_10 = arith.constant 0 : index
    %10 = vector.load %arg2[%c216, %c0_10] : memref<224x32xf32, #tpu.memory_space<vmem>>, vector<1x32xf32>
    %c0_11 = arith.constant 0 : index
    %c0_12 = arith.constant 0 : index
    %11 = vector.load %arg3[%c0_11, %c0_12] : memref<32x16xf32, #tpu.memory_space<vmem>>, vector<16x16xf32>
    %c16 = arith.constant 16 : index
    %c0_13 = arith.constant 0 : index
    %12 = vector.load %arg3[%c16, %c0_13] : memref<32x16xf32, #tpu.memory_space<vmem>>, vector<16x16xf32>
    %cst = arith.constant dense<0.000000e+00> : vector<16x16xf32>
    %13 = tpu.matmul %2, %2, %cst {dimension_numbers = #tpu.dot_dimension_numbers<[1], [1], [0], [0], [0, 0, 1, 0], [], []>} : vector<16x32xf32>, vector<16x32xf32>, vector<16x16xf32> -> vector<16x16xf32>
    %cst_14 = arith.constant dense<0.000000e+00> : vector<16xf32>
    %14 = vector.multi_reduction <add>, %13, %cst_14 [1] : vector<16x16xf32> to vector<16xf32>
    %15 = vector.shape_cast %14 : vector<16xf32> to vector<16x1xf32>
    %cst_15 = arith.constant 1.600000e+01 : f32
    %16 = vector.broadcast %cst_15 : f32 to vector<16x1xf32>
    %17 = arith.divf %15, %16 : vector<16x1xf32>
    %18 = arith.mulf %13, %13 : vector<16x16xf32>
    %cst_16 = arith.constant dense<0.000000e+00> : vector<16xf32>
    %19 = vector.multi_reduction <add>, %18, %cst_16 [1] : vector<16x16xf32> to vector<16xf32>
    %20 = vector.shape_cast %19 : vector<16xf32> to vector<16x1xf32>
    %cst_17 = arith.constant 1.600000e+01 : f32
    %21 = vector.broadcast %cst_17 : f32 to vector<16x1xf32>
    %22 = arith.divf %20, %21 : vector<16x1xf32>
    %23 = arith.mulf %17, %17 : vector<16x1xf32>
    %24 = arith.subf %22, %23 : vector<16x1xf32>
    %25 = vector.broadcast %17 : vector<16x1xf32> to vector<16x16xf32>
    %26 = arith.subf %13, %25 : vector<16x16xf32>
    %cst_18 = arith.constant 9.99999974E-6 : f32
    %27 = vector.broadcast %cst_18 : f32 to vector<16x1xf32>
    %28 = arith.addf %24, %27 : vector<16x1xf32>
    %29 = math.rsqrt %28 : vector<16x1xf32>
    %30 = vector.broadcast %29 : vector<16x1xf32> to vector<16x16xf32>
    %31 = arith.mulf %26, %30 : vector<16x16xf32>
    %cst_19 = arith.constant 0.000000e+00 : f32
    %32 = vector.broadcast %cst_19 : f32 to vector<16x16xf32>
    %33 = arith.maximumf %31, %32 : vector<16x16xf32>
    %cst_20 = arith.constant dense<0xFF800000> : vector<16xf32>
    %34 = vector.multi_reduction <maximumf>, %33, %cst_20 [1] : vector<16x16xf32> to vector<16xf32>
    %35 = vector.shape_cast %34 : vector<16xf32> to vector<16x1xf32>
    %36 = vector.broadcast %35 : vector<16x1xf32> to vector<16x16xf32>
    %37 = arith.subf %33, %36 : vector<16x16xf32>
    %38 = math.exp %37 : vector<16x16xf32>
    %cst_21 = arith.constant dense<0.000000e+00> : vector<16xf32>
    %39 = vector.multi_reduction <add>, %38, %cst_21 [1] : vector<16x16xf32> to vector<16xf32>
    %40 = vector.shape_cast %39 : vector<16xf32> to vector<16x1xf32>
    %41 = tpu.reciprocal %40 {approx = true} : vector<16x1xf32> -> vector<16x1xf32>
    %42 = vector.broadcast %41 : vector<16x1xf32> to vector<16x16xf32>
    %43 = arith.mulf %38, %42 : vector<16x16xf32>
    %c0_22 = arith.constant 0 : index
    %c0_23 = arith.constant 0 : index
    %c0_24 = arith.constant 0 : index
    %44 = vector.load %arg5[%c0_22, %c0_23, %c0_24] : memref<1x16x16xf32, #tpu.memory_space<vmem>>, vector<1x16x16xf32>
    %45 = vector.shape_cast %44 : vector<1x16x16xf32> to vector<16x16xf32>
    %46 = vector.shape_cast %43 : vector<16x16xf32> to vector<1x16x16xf32>
    tpu.vector_store %arg5[%c0_22, %c0_23, %c0_24], %46 {strides = array<i32>} : memref<1x16x16xf32, #tpu.memory_space<vmem>>, vector<1x16x16xf32>,
    %cst_25 = arith.constant dense<0.000000e+00> : vector<16x16xf32>
    %47 = tpu.matmul %3, %3, %cst_25 {dimension_numbers = #tpu.dot_dimension_numbers<[1], [1], [0], [0], [0, 0, 1, 0], [], []>} : vector<16x32xf32>, vector<16x32xf32>, vector<16x16xf32> -> vector<16x16xf32>
    %cst_26 = arith.constant dense<0.000000e+00> : vector<16xf32>
    %48 = vector.multi_reduction <add>, %47, %cst_26 [1] : vector<16x16xf32> to vector<16xf32>
    %49 = vector.shape_cast %48 : vector<16xf32> to vector<16x1xf32>
    %cst_27 = arith.constant 1.600000e+01 : f32
    %50 = vector.broadcast %cst_27 : f32 to vector<16x1xf32>
    %51 = arith.divf %49, %50 : vector<16x1xf32>
    %52 = arith.mulf %47, %47 : vector<16x16xf32>
    %cst_28 = arith.constant dense<0.000000e+00> : vector<16xf32>
    %53 = vector.multi_reduction <add>, %52, %cst_28 [1] : vector<16x16xf32> to vector<16xf32>
    %54 = vector.shape_cast %53 : vector<16xf32> to vector<16x1xf32>
    %cst_29 = arith.constant 1.600000e+01 : f32
    %55 = vector.broadcast %cst_29 : f32 to vector<16x1xf32>
    %56 = arith.divf %54, %55 : vector<16x1xf32>
    %57 = arith.mulf %51, %51 : vector<16x1xf32>
    %58 = arith.subf %56, %57 : vector<16x1xf32>
    %59 = vector.broadcast %51 : vector<16x1xf32> to vector<16x16xf32>
    %60 = arith.subf %47, %59 : vector<16x16xf32>
    %cst_30 = arith.constant 9.99999974E-6 : f32
    %61 = vector.broadcast %cst_30 : f32 to vector<16x1xf32>
    %62 = arith.addf %58, %61 : vector<16x1xf32>
    %63 = math.rsqrt %62 : vector<16x1xf32>
    %64 = vector.broadcast %63 : vector<16x1xf32> to vector<16x16xf32>
    %65 = arith.mulf %60, %64 : vector<16x16xf32>
    %c0_31 = arith.constant 0 : index
    %c0_32 = arith.constant 0 : index
    %c0_33 = arith.constant 0 : index
    %66 = vector.load %arg1[%c0_31, %c0_32, %c0_33] : memref<1x16x24xf32, #tpu.memory_space<vmem>>, vector<1x16x24xf32>
    %67 = vector.shape_cast %66 : vector<1x16x24xf32> to vector<16x24xf32>
    %cst_34 = arith.constant dense<0.000000e+00> : vector<16x32xf32>
    %68 = tpu.matmul %67, %0, %cst_34 {dimension_numbers = #tpu.dot_dimension_numbers<[1], [0], [0], [1], [0, 0, 1, 1], [], []>} : vector<16x24xf32>, vector<24x32xf32>, vector<16x32xf32> -> vector<16x32xf32>
    %69 = vector.broadcast %1 : vector<1x32xf32> to vector<16x32xf32>
    %70 = arith.addf %68, %69 : vector<16x32xf32>
    %cst_35 = arith.constant dense<0.000000e+00> : vector<16xf32>
    %71 = vector.multi_reduction <add>, %70, %cst_35 [1] : vector<16x32xf32> to vector<16xf32>
    %72 = vector.shape_cast %71 : vector<16xf32> to vector<16x1xf32>
    %cst_36 = arith.constant 3.200000e+01 : f32
    %73 = vector.broadcast %cst_36 : f32 to vector<16x1xf32>
    %74 = arith.divf %72, %73 : vector<16x1xf32>
    %75 = arith.mulf %70, %70 : vector<16x32xf32>
    %cst_37 = arith.constant dense<0.000000e+00> : vector<16xf32>
    %76 = vector.multi_reduction <add>, %75, %cst_37 [1] : vector<16x32xf32> to vector<16xf32>
    %77 = vector.shape_cast %76 : vector<16xf32> to vector<16x1xf32>
    %cst_38 = arith.constant 3.200000e+01 : f32
    %78 = vector.broadcast %cst_38 : f32 to vector<16x1xf32>
    %79 = arith.divf %77, %78 : vector<16x1xf32>
    %80 = arith.mulf %74, %74 : vector<16x1xf32>
    %81 = arith.subf %79, %80 : vector<16x1xf32>
    %82 = vector.broadcast %74 : vector<16x1xf32> to vector<16x32xf32>
    %83 = arith.subf %70, %82 : vector<16x32xf32>
    %cst_39 = arith.constant 9.99999974E-6 : f32
    %84 = vector.broadcast %cst_39 : f32 to vector<16x1xf32>
    %85 = arith.addf %81, %84 : vector<16x1xf32>
    %86 = math.rsqrt %85 : vector<16x1xf32>
    %87 = vector.broadcast %86 : vector<16x1xf32> to vector<16x32xf32>
    %88 = arith.mulf %83, %87 : vector<16x32xf32>
    %cst_40 = arith.constant dense<0.000000e+00> : vector<16x32xf32>
    %89 = tpu.matmul %2, %4, %cst_40 {dimension_numbers = #tpu.dot_dimension_numbers<[1], [0], [0], [1], [0, 0, 1, 1], [], []>} : vector<16x32xf32>, vector<32x32xf32>, vector<16x32xf32> -> vector<16x32xf32>
    %cst_41 = arith.constant dense<0.000000e+00> : vector<16x32xf32>
    %90 = tpu.matmul %88, %5, %cst_41 {dimension_numbers = #tpu.dot_dimension_numbers<[1], [0], [0], [1], [0, 0, 1, 1], [], []>} : vector<16x32xf32>, vector<32x32xf32>, vector<16x32xf32> -> vector<16x32xf32>
    %91 = arith.addf %89, %90 : vector<16x32xf32>
    %92 = arith.negf %91 : vector<16x32xf32>
    %93 = math.exp %92 : vector<16x32xf32>
    %cst_42 = arith.constant 1.000000e+00 : f32
    %94 = vector.broadcast %cst_42 : f32 to vector<16x32xf32>
    %95 = arith.addf %94, %93 : vector<16x32xf32>
    %96 = arith.divf %94, %95 : vector<16x32xf32>
    %97 = arith.mulf %96, %2 : vector<16x32xf32>
    %cst_43 = arith.constant 1.000000e+00 : f32
    %98 = vector.broadcast %cst_43 : f32 to vector<16x32xf32>
    %99 = arith.subf %98, %96 : vector<16x32xf32>
    %100 = arith.mulf %99, %88 : vector<16x32xf32>
    %101 = arith.addf %97, %100 : vector<16x32xf32>
    %102 = arith.addf %101, %2 : vector<16x32xf32>
    %cst_44 = arith.constant dense<0.000000e+00> : vector<16xf32>
    %103 = vector.multi_reduction <add>, %102, %cst_44 [1] : vector<16x32xf32> to vector<16xf32>
    %104 = vector.shape_cast %103 : vector<16xf32> to vector<16x1xf32>
    %cst_45 = arith.constant 3.200000e+01 : f32
    %105 = vector.broadcast %cst_45 : f32 to vector<16x1xf32>
    %106 = arith.divf %104, %105 : vector<16x1xf32>
    %107 = arith.mulf %102, %102 : vector<16x32xf32>
    %cst_46 = arith.constant dense<0.000000e+00> : vector<16xf32>
    %108 = vector.multi_reduction <add>, %107, %cst_46 [1] : vector<16x32xf32> to vector<16xf32>
    %109 = vector.shape_cast %108 : vector<16xf32> to vector<16x1xf32>
    %cst_47 = arith.constant 3.200000e+01 : f32
    %110 = vector.broadcast %cst_47 : f32 to vector<16x1xf32>
    %111 = arith.divf %109, %110 : vector<16x1xf32>
    %112 = arith.mulf %106, %106 : vector<16x1xf32>
    %113 = arith.subf %111, %112 : vector<16x1xf32>
    %114 = vector.broadcast %106 : vector<16x1xf32> to vector<16x32xf32>
    %115 = arith.subf %102, %114 : vector<16x32xf32>
    %cst_48 = arith.constant 9.99999974E-6 : f32
    %116 = vector.broadcast %cst_48 : f32 to vector<16x1xf32>
    %117 = arith.addf %113, %116 : vector<16x1xf32>
    %118 = math.rsqrt %117 : vector<16x1xf32>
    %119 = vector.broadcast %118 : vector<16x1xf32> to vector<16x32xf32>
    %120 = arith.mulf %115, %119 : vector<16x32xf32>
    %cst_49 = arith.constant dense<0.000000e+00> : vector<16xf32>
    %121 = vector.multi_reduction <add>, %120, %cst_49 [1] : vector<16x32xf32> to vector<16xf32>
    %122 = vector.shape_cast %121 : vector<16xf32> to vector<16x1xf32>
    %123 = vector.broadcast %122 : vector<16x1xf32> to vector<16x32xf32>
    %124 = arith.mulf %123, %6 : vector<16x32xf32>
    %125 = arith.addf %124, %120 : vector<16x32xf32>
    %cst_50 = arith.constant dense<0.000000e+00> : vector<16x16xf32>
    %126 = tpu.matmul %125, %125, %cst_50 {dimension_numbers = #tpu.dot_dimension_numbers<[1], [1], [0], [0], [0, 0, 1, 0], [], []>} : vector<16x32xf32>, vector<16x32xf32>, vector<16x16xf32> -> vector<16x16xf32>
    %cst_51 = arith.constant dense<0.000000e+00> : vector<16xf32>
    %127 = vector.multi_reduction <add>, %126, %cst_51 [1] : vector<16x16xf32> to vector<16xf32>
    %128 = vector.shape_cast %127 : vector<16xf32> to vector<16x1xf32>
    %cst_52 = arith.constant 1.600000e+01 : f32
    %129 = vector.broadcast %cst_52 : f32 to vector<16x1xf32>
    %130 = arith.divf %128, %129 : vector<16x1xf32>
    %131 = arith.mulf %126, %126 : vector<16x16xf32>
    %cst_53 = arith.constant dense<0.000000e+00> : vector<16xf32>
    %132 = vector.multi_reduction <add>, %131, %cst_53 [1] : vector<16x16xf32> to vector<16xf32>
    %133 = vector.shape_cast %132 : vector<16xf32> to vector<16x1xf32>
    %cst_54 = arith.constant 1.600000e+01 : f32
    %134 = vector.broadcast %cst_54 : f32 to vector<16x1xf32>
    %135 = arith.divf %133, %134 : vector<16x1xf32>
    %136 = arith.mulf %130, %130 : vector<16x1xf32>
    %137 = arith.subf %135, %136 : vector<16x1xf32>
    %138 = vector.broadcast %130 : vector<16x1xf32> to vector<16x16xf32>
    %139 = arith.subf %126, %138 : vector<16x16xf32>
    %cst_55 = arith.constant 9.99999974E-6 : f32
    %140 = vector.broadcast %cst_55 : f32 to vector<16x1xf32>
    %141 = arith.addf %137, %140 : vector<16x1xf32>
    %142 = math.rsqrt %141 : vector<16x1xf32>
    %143 = vector.broadcast %142 : vector<16x1xf32> to vector<16x16xf32>
    %144 = arith.mulf %139, %143 : vector<16x16xf32>
    %cst_56 = arith.constant dense<0.000000e+00> : vector<16x32xf32>
    %145 = tpu.matmul %120, %7, %cst_56 {dimension_numbers = #tpu.dot_dimension_numbers<[1], [0], [0], [1], [0, 0, 1, 1], [], []>} : vector<16x32xf32>, vector<32x32xf32>, vector<16x32xf32> -> vector<16x32xf32>
    %146 = vector.broadcast %8 : vector<1x32xf32> to vector<16x32xf32>
    %147 = arith.addf %145, %146 : vector<16x32xf32>
    %cst_57 = arith.constant dense<0.000000e+00> : vector<16x32xf32>
    %148 = tpu.matmul %120, %9, %cst_57 {dimension_numbers = #tpu.dot_dimension_numbers<[1], [0], [0], [1], [0, 0, 1, 1], [], []>} : vector<16x32xf32>, vector<32x32xf32>, vector<16x32xf32> -> vector<16x32xf32>
    %149 = vector.broadcast %10 : vector<1x32xf32> to vector<16x32xf32>
    %150 = arith.addf %148, %149 : vector<16x32xf32>
    %cst_58 = arith.constant dense<0.000000e+00> : vector<16x16xf32>
    %151 = tpu.matmul %147, %150, %cst_58 {dimension_numbers = #tpu.dot_dimension_numbers<[1], [1], [0], [0], [0, 0, 1, 0], [], []>} : vector<16x32xf32>, vector<16x32xf32>, vector<16x16xf32> -> vector<16x16xf32>
    %cst_59 = arith.constant dense<0.000000e+00> : vector<16xf32>
    %152 = vector.multi_reduction <add>, %151, %cst_59 [1] : vector<16x16xf32> to vector<16xf32>
    %153 = vector.shape_cast %152 : vector<16xf32> to vector<16x1xf32>
    %cst_60 = arith.constant 1.600000e+01 : f32
    %154 = vector.broadcast %cst_60 : f32 to vector<16x1xf32>
    %155 = arith.divf %153, %154 : vector<16x1xf32>
    %156 = arith.mulf %151, %151 : vector<16x16xf32>
    %cst_61 = arith.constant dense<0.000000e+00> : vector<16xf32>
    %157 = vector.multi_reduction <add>, %156, %cst_61 [1] : vector<16x16xf32> to vector<16xf32>
    %158 = vector.shape_cast %157 : vector<16xf32> to vector<16x1xf32>
    %cst_62 = arith.constant 1.600000e+01 : f32
    %159 = vector.broadcast %cst_62 : f32 to vector<16x1xf32>
    %160 = arith.divf %158, %159 : vector<16x1xf32>
    %161 = arith.mulf %155, %155 : vector<16x1xf32>
    %162 = arith.subf %160, %161 : vector<16x1xf32>
    %163 = vector.broadcast %155 : vector<16x1xf32> to vector<16x16xf32>
    %164 = arith.subf %151, %163 : vector<16x16xf32>
    %cst_63 = arith.constant 9.99999974E-6 : f32
    %165 = vector.broadcast %cst_63 : f32 to vector<16x1xf32>
    %166 = arith.addf %162, %165 : vector<16x1xf32>
    %167 = math.rsqrt %166 : vector<16x1xf32>
    %168 = vector.broadcast %167 : vector<16x1xf32> to vector<16x16xf32>
    %169 = arith.mulf %164, %168 : vector<16x16xf32>
    %170 = arith.addf %169, %144 : vector<16x16xf32>
    %cst_64 = arith.constant dense<0.000000e+00> : vector<16xf32>
    %171 = vector.multi_reduction <add>, %170, %cst_64 [1] : vector<16x16xf32> to vector<16xf32>
    %172 = vector.shape_cast %171 : vector<16xf32> to vector<16x1xf32>
    %cst_65 = arith.constant 1.600000e+01 : f32
    %173 = vector.broadcast %cst_65 : f32 to vector<16x1xf32>
    %174 = arith.divf %172, %173 : vector<16x1xf32>
    %175 = arith.mulf %170, %170 : vector<16x16xf32>
    %cst_66 = arith.constant dense<0.000000e+00> : vector<16xf32>
    %176 = vector.multi_reduction <add>, %175, %cst_66 [1] : vector<16x16xf32> to vector<16xf32>
    %177 = vector.shape_cast %176 : vector<16xf32> to vector<16x1xf32>
    %cst_67 = arith.constant 1.600000e+01 : f32
    %178 = vector.broadcast %cst_67 : f32 to vector<16x1xf32>
    %179 = arith.divf %177, %178 : vector<16x1xf32>
    %180 = arith.mulf %174, %174 : vector<16x1xf32>
    %181 = arith.subf %179, %180 : vector<16x1xf32>
    %182 = vector.broadcast %174 : vector<16x1xf32> to vector<16x16xf32>
    %183 = arith.subf %170, %182 : vector<16x16xf32>
    %cst_68 = arith.constant 9.99999974E-6 : f32
    %184 = vector.broadcast %cst_68 : f32 to vector<16x1xf32>
    %185 = arith.addf %181, %184 : vector<16x1xf32>
    %186 = math.rsqrt %185 : vector<16x1xf32>
    %187 = vector.broadcast %186 : vector<16x1xf32> to vector<16x16xf32>
    %188 = arith.mulf %183, %187 : vector<16x16xf32>
    %cst_69 = arith.constant dense<0.000000e+00> : vector<16x16xf32>
    %189 = tpu.matmul %188, %11, %cst_69 {dimension_numbers = #tpu.dot_dimension_numbers<[1], [0], [0], [1], [0, 0, 1, 1], [], []>} : vector<16x16xf32>, vector<16x16xf32>, vector<16x16xf32> -> vector<16x16xf32>
    %cst_70 = arith.constant 0.000000e+00 : f32
    %190 = vector.broadcast %cst_70 : f32 to vector<16x16xf32>
    %191 = arith.maximumf %189, %190 : vector<16x16xf32>
    %cst_71 = arith.constant dense<0.000000e+00> : vector<16x16xf32>
    %192 = tpu.matmul %191, %12, %cst_71 {dimension_numbers = #tpu.dot_dimension_numbers<[1], [0], [0], [1], [0, 0, 1, 1], [], []>} : vector<16x16xf32>, vector<16x16xf32>, vector<16x16xf32> -> vector<16x16xf32>
    %193 = arith.addf %192, %170 : vector<16x16xf32>
    %cst_72 = arith.constant dense<0.000000e+00> : vector<16xf32>
    %194 = vector.multi_reduction <add>, %193, %cst_72 [1] : vector<16x16xf32> to vector<16xf32>
    %195 = vector.shape_cast %194 : vector<16xf32> to vector<16x1xf32>
    %cst_73 = arith.constant 1.600000e+01 : f32
    %196 = vector.broadcast %cst_73 : f32 to vector<16x1xf32>
    %197 = arith.divf %195, %196 : vector<16x1xf32>
    %198 = arith.mulf %193, %193 : vector<16x16xf32>
    %cst_74 = arith.constant dense<0.000000e+00> : vector<16xf32>
    %199 = vector.multi_reduction <add>, %198, %cst_74 [1] : vector<16x16xf32> to vector<16xf32>
    %200 = vector.shape_cast %199 : vector<16xf32> to vector<16x1xf32>
    %cst_75 = arith.constant 1.600000e+01 : f32
    %201 = vector.broadcast %cst_75 : f32 to vector<16x1xf32>
    %202 = arith.divf %200, %201 : vector<16x1xf32>
    %203 = arith.mulf %197, %197 : vector<16x1xf32>
    %204 = arith.subf %202, %203 : vector<16x1xf32>
    %205 = vector.broadcast %197 : vector<16x1xf32> to vector<16x16xf32>
    %206 = arith.subf %193, %205 : vector<16x16xf32>
    %cst_76 = arith.constant 9.99999974E-6 : f32
    %207 = vector.broadcast %cst_76 : f32 to vector<16x1xf32>
    %208 = arith.addf %204, %207 : vector<16x1xf32>
    %209 = math.rsqrt %208 : vector<16x1xf32>
    %210 = vector.broadcast %209 : vector<16x1xf32> to vector<16x16xf32>
    %211 = arith.mulf %206, %210 : vector<16x16xf32>
    %212 = arith.addf %211, %65 : vector<16x16xf32>
    %cst_77 = arith.constant dense<0.000000e+00> : vector<16xf32>
    %213 = vector.multi_reduction <add>, %212, %cst_77 [1] : vector<16x16xf32> to vector<16xf32>
    %214 = vector.shape_cast %213 : vector<16xf32> to vector<16x1xf32>
    %cst_78 = arith.constant 1.600000e+01 : f32
    %215 = vector.broadcast %cst_78 : f32 to vector<16x1xf32>
    %216 = arith.divf %214, %215 : vector<16x1xf32>
    %217 = arith.mulf %212, %212 : vector<16x16xf32>
    %cst_79 = arith.constant dense<0.000000e+00> : vector<16xf32>
    %218 = vector.multi_reduction <add>, %217, %cst_79 [1] : vector<16x16xf32> to vector<16xf32>
    %219 = vector.shape_cast %218 : vector<16xf32> to vector<16x1xf32>
    %cst_80 = arith.constant 1.600000e+01 : f32
    %220 = vector.broadcast %cst_80 : f32 to vector<16x1xf32>
    %221 = arith.divf %219, %220 : vector<16x1xf32>
    %222 = arith.mulf %216, %216 : vector<16x1xf32>
    %223 = arith.subf %221, %222 : vector<16x1xf32>
    %224 = vector.broadcast %216 : vector<16x1xf32> to vector<16x16xf32>
    %225 = arith.subf %212, %224 : vector<16x16xf32>
    %cst_81 = arith.constant 9.99999974E-6 : f32
    %226 = vector.broadcast %cst_81 : f32 to vector<16x1xf32>
    %227 = arith.addf %223, %226 : vector<16x1xf32>
    %228 = math.rsqrt %227 : vector<16x1xf32>
    %229 = vector.broadcast %228 : vector<16x1xf32> to vector<16x16xf32>
    %230 = arith.mulf %225, %229 : vector<16x16xf32>
    %cst_82 = arith.constant 0.000000e+00 : f32
    %231 = vector.broadcast %cst_82 : f32 to vector<16x16xf32>
    %232 = arith.maximumf %230, %231 : vector<16x16xf32>
    %cst_83 = arith.constant dense<0xFF800000> : vector<16xf32>
    %233 = vector.multi_reduction <maximumf>, %232, %cst_83 [1] : vector<16x16xf32> to vector<16xf32>
    %234 = vector.shape_cast %233 : vector<16xf32> to vector<16x1xf32>
    %235 = vector.broadcast %234 : vector<16x1xf32> to vector<16x16xf32>
    %236 = arith.subf %232, %235 : vector<16x16xf32>
    %237 = math.exp %236 : vector<16x16xf32>
    %cst_84 = arith.constant dense<0.000000e+00> : vector<16xf32>
    %238 = vector.multi_reduction <add>, %237, %cst_84 [1] : vector<16x16xf32> to vector<16xf32>
    %239 = vector.shape_cast %238 : vector<16xf32> to vector<16x1xf32>
    %240 = tpu.reciprocal %239 {approx = true} : vector<16x1xf32> -> vector<16x1xf32>
    %241 = vector.broadcast %240 : vector<16x1xf32> to vector<16x16xf32>
    %242 = arith.mulf %237, %241 : vector<16x16xf32>
    %c0_85 = arith.constant 0 : index
    %c0_86 = arith.constant 0 : index
    %c0_87 = arith.constant 0 : index
    %243 = vector.load %arg4[%c0_85, %c0_86, %c0_87] : memref<1x16x16xf32, #tpu.memory_space<vmem>>, vector<1x16x16xf32>
    %244 = vector.shape_cast %243 : vector<1x16x16xf32> to vector<16x16xf32>
    %245 = vector.shape_cast %242 : vector<16x16xf32> to vector<1x16x16xf32>
    tpu.vector_store %arg4[%c0_85, %c0_86, %c0_87], %245 {strides = array<i32>} : memref<1x16x16xf32, #tpu.memory_space<vmem>>, vector<1x16x16xf32>,
    return
  }
  func.func @transform_0(%arg0: i32) -> (i32, i32, i32) {
    %c0_i32 = arith.constant 0 : i32
    %c0_i32_0 = arith.constant 0 : i32
    %c0_i32_1 = arith.constant 0 : i32
    return %arg0, %c0_i32, %c0_i32_0 : i32, i32, i32
  }
  func.func @transform_1(%arg0: i32) -> (i32, i32) {
    %c0_i32 = arith.constant 0 : i32
    %c0_i32_0 = arith.constant 0 : i32
    %c0_i32_1 = arith.constant 0 : i32
    return %c0_i32, %c0_i32_0 : i32, i32
  }
  func.func @transform_2(%arg0: i32) -> (i32, i32) {
    %c0_i32 = arith.constant 0 : i32
    %c0_i32_0 = arith.constant 0 : i32
    %c0_i32_1 = arith.constant 0 : i32
    return %c0_i32, %c0_i32_0 : i32, i32
  }
  func.func @transform_3(%arg0: i32) -> (i32, i32, i32) {
    %c0_i32 = arith.constant 0 : i32
    %c0_i32_0 = arith.constant 0 : i32
    %c0_i32_1 = arith.constant 0 : i32
    return %arg0, %c0_i32, %c0_i32_0 : i32, i32, i32
  }
  func.func @transform_4(%arg0: i32) -> (i32, i32, i32) {
    %c0_i32 = arith.constant 0 : i32
    %c0_i32_0 = arith.constant 0 : i32
    %c0_i32_1 = arith.constant 0 : i32
    return %arg0, %c0_i32, %c0_i32_0 : i32, i32, i32
  }
}

</mosaic_0001>

<bundles_post_ra>
// kernel: mul.21
= control target key start
LH: loop header
LB: loop body
LE: loop exit
PB: predicated region body
PF: predicated region fallthrough
CT: control target
= control target key end

     0   :  { %s34_s0 = inlined_call_operand.vmem [shape: f32[1,32], index: 0, kind: input, shape index: {}]   ;;  %s35_s1 = inlined_call_operand.vmem [shape: f32[1,32], index: 1, kind: input, shape index: {}]   ;;  %s36_s2 = inlined_call_operand.vmem [shape: f32[1,32], index: 2, kind: output, shape index: {}]  }
   0x1   :  { %v3_v0 = vld [vmem:[%s34_s0] sm:$0x1] }
   0x2   :  { %v4_v1 = vld [vmem:[%s35_s1] sm:$0x1] }
   0x3   :  { %v7_v2 = vmul.f32 %v4_v1, %v3_v0 }
   0x5   :  { %9 = vst [vmem:[%s36_s2] sm:$0x1] %v7_v2 }

// kernel: graph_constructor_forward.1
= control target key start
LH: loop header
LB: loop body
LE: loop exit
PB: predicated region body
PF: predicated region fallthrough
CT: control target
= control target key end

     0   :  { %10 = vsyncpa [#allocation3], 0  ;;  %s2543_s0 = inlined_call_operand.vmem [shape: f32[2,16,24], index: 0, kind: input, shape index: {}]   ;;  %s2544_s1 = inlined_call_operand.vmem [shape: f32[224,32], index: 1, kind: input, shape index: {}]   ;;  %s2545_s2 = inlined_call_operand.vmem [shape: f32[32,16], index: 2, kind: input, shape index: {}]   ;;  %s2546_s3 = inlined_call_operand.hbm [shape: f32[2,16,16], index: 3, kind: output, shape index: {0}]   ;;  %s2547_s4 = inlined_call_operand.hbm [shape: f32[2,16,16], index: 4, kind: output, shape index: {1}]  }
   0x1   :  { %12 = vsyncpa [#allocation3 + $0x1], 0 }
   0x2   :  { %13 = vsyncpa [#allocation5], 0 }
   0x3   :  { %15 = vsyncpa [#allocation5 + $0x1], 0  ;;  %s2135_s15 = smov 0   ;;  %s2137_s16 = smov 0  }
   0x4   :  { %s2139_s17 = smov 0   ;;  %s2141_s18 = smov 0  }
   0x5 LB: > { %s2156_s19 = sadd.s32 4294967295, %s2104_s18   ;;  %s1632_s20 = sadd.s32 4294967294, %s2104_s18   ;;  %s2104_s18 = sphi %s2141_s18, %s2555_s18   ;;  %s2100_s17 = sphi %s2139_s17, %s2554_s17   ;;  %s2096_s16 = sphi %s2137_s16, %s2553_s16   ;;  %s2092_s15 = sphi %s2135_s15, %s2552_s15  }
   0x6   : > { %s2160_s21 = sadd.s32 1, %s2104_s18   ;;  %s96_s22 = sadd.s32 1, %s2100_s17 }
   0x7   : > { %s93_s23 = ssub.s32 %s2104_s18, %s2160_s21  ;;  %p106_p0 = scmp.ne.s32.totalorder %s2100_s17, %s2096_s16 }
   0x8   : > { %p94_p1 = scmp.eq.s32.totalorder %s93_s23, 0  ;;  %p107_p2 = scmp.eq.s32.totalorder %s2156_s19, 1 }
   0x9   : > { %p112_p3 = scmp.ne.s32.totalorder %s2096_s16, %s2092_s15  ;;  %p113_p4 = scmp.eq.s32.totalorder %s1632_s20, 1 }
   0xa   : > { %s2171_s24 = scalar_select %p94_p1, %s2100_s17, %s96_s22  }
   0xb   : > { %p2173_p5 = por %p107_p2, %p106_p0  ;;  %p2177_p6 = por %p113_p4, %p112_p3 }
   0xc   : > { %p1635_p7 = scmp.ge.s32.totalorder %s2104_s18, 1  ;;  %p171_p8 = scmp.lt.s32.totalorder %s2104_s18, 3 }
   0xe   : > { %p172_p9 = pnand %p1635_p7, %p171_p8 }
   0xf   : > { %v2186_v0 = vld [vmem:[%s2544_s1 + $0x20] sm:$0xff] (!%p172_p9)  ;;  %v2191_v1 = vld [vmem:[%s2544_s1 + $0x28] sm:$0xff] (!%p172_p9)  ;;  %vm239_vm0 = vcmask (!%p172_p9), 261120   ;;  %p202_p10 = scmp.lt.s32.totalorder (!%p172_p9), %s2156_s19, 1  ;;  %vm496_vm2 = vcmask (!%p172_p9), 195584   ;;  %v209_v8 = vld [vmem:[%s2544_s1 + $0x10] sm:$0xff] (!%p172_p9) }
  0x10   : > { %175 = sbr.rel (%p172_p9) target bundleno = 2866 (0xb32), region = 32  ;;  %v207_v2 = vld [vmem:[%s2544_s1] sm:$0xff] (!%p172_p9)  ;;  %v1834_v3 = vpack.c.bf16 (!%p172_p9), %v2191_v1, %v2186_v0  ;;  %vm2201_vm1 = vmpackc.low (!%p172_p9), %vm239_vm0, %vm239_vm0  ;;  %1743 = vmatprep.mubr.msk.f32.mxu0 (!%p172_p9), %vm239_vm0, %v2186_v0  ;;  %v208_v5 = vld [vmem:[%s2544_s1 + $0x8] sm:$0xff] (!%p172_p9)  ;;  %vm321_vm3 = vcmask (!%p172_p9), 130048   ;;  %s2440_s28 = sand.u32 (!%p172_p9), 1, %s2096_s16  }
  0x11   : > { %v1846_v6 = vpack.c.bf16 (!%p172_p9), %v208_v5, %v207_v2  ;;  %v1648_v12 = vld [vmem:[%s2544_s1 + $0x18] ss:$0 sm:$0xff] (!%p172_p9)  ;;  %v213_v23 = vld [vmem:[%s2544_s1 + $0x30] sm:$0xff] (!%p172_p9)  ;;  %v219_v26 = vld [vmem:[%s2544_s1 + $0x60] sm:$0xff] (!%p172_p9)  ;;  %s1636_s29 = sshll.u32 (!%p172_p9), %s2440_s28, 4  ;;  %s1684_s5 = sshll.u32 (!%p172_p9), %s2156_s19, 8 }
  0x12   : > { %1836 = vmatprep.subr.msk.bf16.mxu0 (!%p172_p9), %vm2201_vm1, %v1834_v3  ;;  %v214_v24 = vld [vmem:[%s2544_s1 + $0x38] sm:$0xff] (!%p172_p9)  ;;  %1750 = vmatprep.mubr.msk.f32.mxu1 (!%p172_p9), %vm239_vm0, %v213_v23  ;;  %v220_v27 = vld [vmem:[%s2544_s1 + $0x68] sm:$0xff] (!%p172_p9)  ;;  %v221_v28 = vld [vmem:[%s2544_s1 + $0x70] sm:$0xff] (!%p172_p9)  ;;  %s201_s30 = scalar_lea.vmem (!%p172_p9), [#allocation4], %s1636_s29  ;;  %s2455_s8 = scalar_lea.hbm (!%p172_p9), %s2547_s4, %s1684_s5 }
  0x13   : > { %1839 = vmatpush3.bf16.xpose.msk.msra.mxu0 (!%p172_p9), %vm2201_vm1, %v1834_v3  ;;  %v1840_v25 = vpack.c.bf16 (!%p172_p9), %v214_v24, %v213_v23  ;;  %v1850_v29 = vpack.c.bf16 (!%p172_p9), %v220_v27, %v219_v26  ;;  %v222_v30 = vld [vmem:[%s2544_s1 + $0x78] sm:$0xff] (!%p172_p9)  ;;  %v215_v32 = vld [vmem:[%s2544_s1 + $0x40] sm:$0xff] (!%p172_p9)  ;;  %v216_v33 = vld [vmem:[%s2544_s1 + $0x48] sm:$0xff] (!%p172_p9)  ;;  %s2106_s12 = smov (!%p172_p9), [#allocation4]  }
  0x14   : > { %1847 = vmatprep.subr.bf16.mxu0 (!%p172_p9), %v1846_v6  ;;  %v1854_v31 = vpack.c.bf16 (!%p172_p9), %v222_v30, %v221_v28  ;;  %v1858_v34 = vpack.c.bf16 (!%p172_p9), %v216_v33, %v215_v32  ;;  %v217_v52 = vld [vmem:[%s2544_s1 + $0x50] sm:$0xff] (!%p172_p9)  ;;  %v218_v53 = vld [vmem:[%s2544_s1 + $0x58] sm:$0xff] (!%p172_p9)  ;;  %v232_v27 = vld [vmem:[%s2544_s1 + $0xc8] sm:$0xff] (!%p172_p9) }
  0x15   : > { %1842 = vmatprep.subr.msk.bf16.mxu1 (!%p172_p9), %vm2201_vm1, %v1840_v25  ;;  %v1862_v57 = vpack.c.bf16 (!%p172_p9), %v218_v53, %v217_v52  ;;  %v224_v53 = vld [vmem:[%s2544_s1 + $0x88] sm:$0xff] (!%p172_p9)  ;;  %v1661_v4 = vld [vmem:[%s2544_s1 + $0xb0] ss:$0 sm:$0xff] (!%p172_p9) }
  0x16   : > { %1845 = vmatpush3.bf16.xpose.msk.msra.mxu1 (!%p172_p9), %vm2201_vm1, %v1840_v25 }
  0x17   : > { %s203_s9 = scalar_select %p202_p10, %s2156_s19, 1  ;;  %1851 = vmatprep.subr.bf16.mxu1 %v1850_v29 }
  0x19   : > { %s1683_s10 = sshll.u32 %s203_s9, 4  ;;  %s1538_s9 = sshll.u32 %s201_s30, 4  ;;  %s2457_s9 = int_to_ptr.vmem [resolvable:$true] %s1538_s9 }
  0x1a   : > { %s206_s13 = scalar_lea.vmem %s2543_s0, %s1683_s10  ;;  %1744 = vmatmul.mubr.msk.f32.vlgmr.msra.gmra.mrb[0].mxu0 %vm239_vm0, %v2191_v1  ;;  %s1509_s10 = scalar_lea.sflag [#allocation5], %s2440_s28 }
  0x1b   : > { %v490_v7 = vld [vmem:[%s206_s13] sm:$0xff]  ;;  %1849 = vmatpush3.bf16.msra.mxu0 %v1846_v6  ;;  %v491_v9 = vld [vmem:[%s206_s13 + $0x8] sm:$0xff]  ;;  %s2010_s11 = scalar_lea.vmem %s2457_s9, 256  ;;  %s2014_s13 = sshll.u32 %s2106_s12, 4  ;;  %s2015_s13 = int_to_ptr.vmem [resolvable:$false] %s2014_s13 }
  0x1c   : > { %1759 = vmatprep.mubr.msk.f32.mxu0 %vm496_vm2, %v490_v7  ;;  %1757 = vmatprep.subr.mxu0 %v209_v8  ;;  %p2011_p11 = scmp.ne.s32.totalorder %s2457_s9, %s2010_s11  ;;  %s2016_s14 = scalar_lea.vmem %s2015_s13, 512 }
  0x1d   : > { %1751 = vmatmul.mubr.msk.f32.vlgmr.msra.gmra.mrb[0].mxu1 %vm239_vm0, %v214_v24  ;;  %p2017_p0 = scmp.lt.s32.totalorder %s2457_s9, %s2015_s13  ;;  %p2018_p1 = scmp.lt.s32.totalorder %s2016_s14, %s2010_s11 }
  0x1e   : > { %1853 = vmatpush3.bf16.msra.mxu1 %v1850_v29  ;;  %v233_v29 = vld [vmem:[%s2544_s1 + $0xd0] sm:$0xff]  ;;  %p2012_p12 = pnand %p2011_p11, %p2173_p5 }
  0x1f   : > { %1758 = vmatpush3.msra.mxu0 %v209_v8  ;;  %1855 = vmatprep.subr.bf16.mxu1 %v1854_v31  ;;  %v1884_v30 = vpack.c.bf16 %v233_v29, %v232_v27  ;;  %p2019_p2 = por %p2018_p1, %p2017_p0 }
  0x20   : > { %1760 = vmatmul.mubr.msk.f32.vlgmr.msra.gmra.mrb[2].mxu0 %vm496_vm2, %v491_v9  ;;  %p2013_p13 = pneg %p2012_p12 }
  0x22   : > { %1857 = vmatpush3.bf16.msra.mxu1 %v1854_v31  ;;  %p2020_p3 = pnand %p2019_p2, %p2013_p13 }
  0x23   : > { %1859 = vmatprep.subr.bf16.mxu1 %v1858_v34 }
  0xed   : > { %v2223_v10 = vpop.f32.mrb[0].mxu0 }
  0xee   : > { %v2225_v11 = vpop.f32.mrb[1].mxu0 }
  0xf0   : > { %v2276_v58 = vpop.f32.mrb[0].mxu1 }
  0xf1   : > { %v2278_v59 = vpop.f32.mrb[1].mxu1 }
  0xf3   : > { %v1761_v13 = vpop.f32.mrb[2].mxu0 }
  0xf4   : > { %v569_v14 = vpop.f32.mrb[3].mxu0  ;;  %v575_v15 = vadd.f32 %v1761_v13, %v1648_v12 }
  0xf5   : > { %v570_v16 = vadd.f32 %v1648_v12, %v569_v14 }
  0xf6   : > { %v588_v20 = vmul.f32 %v575_v15, %v575_v15  ;;  %v581_v21 = vsel %vm239_vm0, %v575_v15, 0.0 }
  0xf7   : > { %v578_v17 = vsel %vm239_vm0, %v570_v16, 0.0  ;;  %v587_v18 = vmul.f32 %v570_v16, %v570_v16 }
  0xf8   : > { %579 = vadd.xlane.f32.xlu0 %v578_v17  ;;  %v592_v22 = vsel %vm239_vm0, %v588_v20, 0.0 }
  0xf9   : > { %v589_v19 = vsel %vm239_vm0, %v587_v18, 0.0 }
  0xfa   : > { %590 = vadd.xlane.f32.xlu1 %v589_v19 }
  0xfc   : > { %582 = vadd.xlane.f32.xlu0 %v581_v21 }
  0xfe   : > { %593 = vadd.xlane.f32.xlu1 %v592_v22 }
 0x185   : > { %v580_v35 = vpop.xlane.xlu0 %579 }
 0x186   : > { %v585_v36 = vmul.f32 0.03125, %v580_v35 }
 0x187   : > { %v591_v37 = vpop.xlane.xlu1 %590 }
 0x188   : > { %v597_v38 = vmul.f32 %v585_v36, %v585_v36  ;;  %v595_v39 = vmul.f32 0.03125, %v591_v37  ;;  %v601_v49 = vsub.f32 %v570_v16, %v585_v36 }
 0x189   : > { %v583_v40 = vpop.xlane.xlu0 %582 }
 0x18a   : > { %v599_v41 = vsub.f32 %v595_v39, %v597_v38  ;;  %v586_v42 = vmul.f32 0.03125, %v583_v40 }
 0x18b   : > { %v594_v43 = vpop.xlane.xlu1 %593 }
 0x18c   : > { %v603_v44 = vadd.f32 1e-05, %v599_v41  ;;  %v598_v45 = vmul.f32 %v586_v42, %v586_v42  ;;  %v596_v46 = vmul.f32 0.03125, %v594_v43  ;;  %v602_v54 = vsub.f32 %v575_v15, %v586_v42 }
 0x18e   : > { %1950 = vrsqrt.f32 %v603_v44  ;;  %v600_v47 = vsub.f32 %v596_v46, %v598_v45 }
 0x190   : > { %v604_v48 = vadd.f32 1e-05, %v600_v47 }
 0x192   : > { %1952 = vrsqrt.f32 %v604_v48 }
 0x198   : > { %v1951_v50 = vpop.eup %1950 }
 0x199   : > { %v607_v51 = vmul.f32 %v1951_v50, %v601_v49 }
 0x19b   : > { %1770 = vmatprep.mubr.msk.f32.mxu1 %vm239_vm0, %v607_v51 }
 0x19c   : > { %v1953_v55 = vpop.eup %1952 }
 0x19d   : > { %v608_v56 = vmul.f32 %v1953_v55, %v602_v54  ;;  %v223_v54 = vld [vmem:[%s2544_s1 + $0x80] sm:$0xff] }
 0x19f   : > { %1771 = vmatmul.mubr.msk.f32.vlgmr.msra.gmra.mrb[2].mxu1 %vm239_vm0, %v608_v56 }
 0x1a0   : > { %1861 = vmatpush3.bf16.msra.mxu1 %v1858_v34  ;;  %1781 = vmatprep.mubr.msk.f32.mxu1 %vm239_vm0, %v2186_v0 }
 0x1a1   : > { %1863 = vmatprep.subr.bf16.mxu1 %v1862_v57 }
 0x1a4   : > { %1865 = vmatpush3.bf16.msra.mxu1 %v1862_v57 }
 0x1a7   : > { %1782 = vmatmul.mubr.msk.f32.vlgmr.msra.gmra.mrb[2].mxu1 %vm239_vm0, %v2191_v1 }
 0x27a   : > { %v1783_v60 = vpop.f32.mrb[2].mxu1 }
 0x27b   : > { %v1656_v61 = vmul.f32 -1.442695, %v1783_v60  ;;  %v756_v62 = vpop.f32.mrb[3].mxu1 }
 0x27c   : > { %v1655_v63 = vmul.f32 -1.442695, %v756_v62  ;;  %v225_v62 = vld [vmem:[%s2544_s1 + $0x90] sm:$0xff] }
 0x27d   : > { %1954 = vpow2.f32 %v1656_v61 }
 0x27e   : > { %1956 = vpow2.f32 %v1655_v63  ;;  %v226_v63 = vld [vmem:[%s2544_s1 + $0x98] sm:$0xff] }
 0x287   : > { %v1955_v2 = vpop.eup %1954 }
 0x288   : > { %v1957_v3 = vpop.eup %1956  ;;  %v772_v5 = vadd.f32 1.0, %v1955_v2 }
 0x289   : > { %v771_v6 = vadd.f32 1.0, %v1957_v3 }
 0x28a   : > { %1958 = vrcp.f32 %v772_v5  ;;  %v1872_v5 = vpack.c.bf16 %v226_v63, %v225_v62 }
 0x28b   : > { %1960 = vrcp.f32 %v771_v6  ;;  %v227_v6 = vld [vmem:[%s2544_s1 + $0xa0] sm:$0xff] }
 0x294   : > { %v1959_v7 = vpop.eup %1958 }
 0x295   : > { %v1961_v8 = vpop.eup %1960  ;;  %v780_v9 = vsub.f32 1.0, %v1959_v7  ;;  %v778_v13 = vmul.f32 %v1959_v7, %v2191_v1  ;;  %v228_v7 = vld [vmem:[%s2544_s1 + $0xa8] sm:$0xff] }
 0x296   : > { %v779_v12 = vsub.f32 1.0, %v1961_v8  ;;  %v777_v15 = vmul.f32 %v1961_v8, %v2186_v0  ;;  %v1876_v8 = vpack.c.bf16 %v228_v7, %v227_v6 }
 0x297   : > { %v782_v14 = vmul.f32 %v780_v9, %v608_v56  ;;  %v1664_v9 = vld [vmem:[%s2544_s1 + $0xd8] ss:$0 sm:$0xff] }
 0x298   : > { %v781_v16 = vmul.f32 %v779_v12, %v607_v51 }
 0x299   : > { %v784_v17 = vadd.f32 %v782_v14, %v778_v13 }
 0x29a   : > { %v783_v18 = vadd.f32 %v781_v16, %v777_v15 }
 0x29b   : > { %v786_v19 = vadd.f32 %v784_v17, %v2191_v1  ;;  %v230_v1 = vld [vmem:[%s2544_s1 + $0xb8] sm:$0xff] }
 0x29c   : > { %v785_v20 = vadd.f32 %v783_v18, %v2186_v0  ;;  %v231_v0 = vld [vmem:[%s2544_s1 + $0xc0] sm:$0xff] }
 0x29d   : > { %v790_v21 = vsel %vm239_vm0, %v786_v19, 0.0  ;;  %v796_v22 = vmul.f32 %v786_v19, %v786_v19  ;;  %v1880_v28 = vpack.c.bf16 %v231_v0, %v230_v1 }
 0x29e   : > { %791 = vadd.xlane.f32.xlu1 %v790_v21  ;;  %v787_v23 = vsel %vm239_vm0, %v785_v20, 0.0  ;;  %v795_v24 = vmul.f32 %v785_v20, %v785_v20 }
 0x29f   : > { %788 = vadd.xlane.f32.xlu0 %v787_v23  ;;  %v800_v25 = vsel %vm239_vm0, %v796_v22, 0.0  ;;  %1881 = vmatprep.subr.bf16.mxu1 %v1880_v28 }
 0x2a0   : > { %v797_v26 = vsel %vm239_vm0, %v795_v24, 0.0  ;;  %1883 = vmatpush3.bf16.msra.mxu1 %v1880_v28 }
 0x2a1   : > { %1885 = vmatprep.subr.bf16.mxu1 %v1884_v30 }
 0x2a2   : > { %801 = vadd.xlane.f32.xlu1 %v800_v25 }
 0x2a3   : > { %798 = vadd.xlane.f32.xlu0 %v797_v26 }
 0x2a4   : > { %1887 = vmatpush3.bf16.msra.mxu1 %v1884_v30 }
 0x32b   : > { %v792_v31 = vpop.xlane.xlu1 %791 }
 0x32c   : > { %v794_v32 = vmul.f32 0.03125, %v792_v31  ;;  %v789_v33 = vpop.xlane.xlu0 %788 }
 0x32d   : > { %v793_v34 = vmul.f32 0.03125, %v789_v33 }
 0x32e   : > { %v806_v36 = vmul.f32 %v794_v32, %v794_v32  ;;  %v810_v45 = vsub.f32 %v786_v19, %v794_v32 }
 0x32f   : > { %v802_v35 = vpop.xlane.xlu1 %801  ;;  %v805_v39 = vmul.f32 %v793_v34, %v793_v34  ;;  %v809_v47 = vsub.f32 %v785_v20, %v793_v34 }
 0x330   : > { %v804_v37 = vmul.f32 0.03125, %v802_v35  ;;  %v799_v38 = vpop.xlane.xlu0 %798 }
 0x331   : > { %v803_v40 = vmul.f32 0.03125, %v799_v38 }
 0x332   : > { %v808_v41 = vsub.f32 %v804_v37, %v806_v36 }
 0x333   : > { %v807_v42 = vsub.f32 %v803_v40, %v805_v39 }
 0x334   : > { %v812_v43 = vadd.f32 1e-05, %v808_v41 }
 0x335   : > { %v811_v44 = vadd.f32 1e-05, %v807_v42 }
 0x336   : > { %1962 = vrsqrt.f32 %v812_v43 }
 0x337   : > { %1964 = vrsqrt.f32 %v811_v44 }
 0x340   : > { %v1963_v46 = vpop.eup %1962 }
 0x341   : > { %v1965_v48 = vpop.eup %1964  ;;  %v816_v49 = vmul.f32 %v1963_v46, %v810_v45 }
 0x342   : > { %v815_v50 = vmul.f32 %v1965_v48, %v809_v47 }
 0x343   : > { %v820_v51 = vsel %vm239_vm0, %v816_v49, 0.0 }
 0x344   : > { %821 = vadd.xlane.f32.xlu1 %v820_v51  ;;  %1810 = vmatprep.mubr.msk.f32.mxu1 %vm239_vm0, %v815_v50  ;;  %v817_v52 = vsel %vm239_vm0, %v815_v50, 0.0 }
 0x345   : > { %1811 = vmatmul.mubr.msk.f32.vlgmr.msra.gmra.mrb[4].mxu1 %vm239_vm0, %v816_v49  ;;  %818 = vadd.xlane.f32.xlu0 %v817_v52 }
 0x3d1   : > { %v822_v55 = vpop.xlane.xlu1 %821 }
 0x3d2   : > { %v824_v56 = vmul.f32 %v822_v55, %v224_v53  ;;  %v819_v57 = vpop.xlane.xlu0 %818 }
 0x3d3   : > { %v823_v60 = vmul.f32 %v819_v57, %v223_v54 }
 0x3d4   : > { %v826_v61 = vadd.f32 %v824_v56, %v816_v49 }
 0x3d5   : > { %v825_v2 = vadd.f32 %v823_v60, %v815_v50 }
 0x3d7   : > { %v1866_v3 = vpack.c.bf16 %v826_v61, %v825_v2  ;;  %1788 = vmatprep.mubr.msk.f32.mxu0 %vm239_vm0, %v825_v2 }
 0x3d9   : > { %1868 = vmatprep.subr.msk.bf16.mxu0 %vm2201_vm1, %v1866_v3 }
 0x3da   : > { %1871 = vmatpush3.bf16.xpose.msk.msra.mxu0 %vm2201_vm1, %v1866_v3 }
 0x3db   : > { %1873 = vmatprep.subr.bf16.mxu0 %v1872_v5 }
 0x3e1   : > { %1789 = vmatmul.mubr.msk.f32.vlgmr.msra.gmra.mrb[4].mxu0 %vm239_vm0, %v826_v61 }
 0x3e2   : > { %1875 = vmatpush3.bf16.msra.mxu0 %v1872_v5  ;;  %1799 = vmatprep.mubr.msk.f32.mxu0 %vm239_vm0, %v815_v50 }
 0x3e3   : > { %1877 = vmatprep.subr.bf16.mxu0 %v1876_v8 }
 0x3e6   : > { %1879 = vmatpush3.bf16.msra.mxu0 %v1876_v8 }
 0x3e9   : > { %1800 = vmatmul.mubr.msk.f32.vlgmr.msra.gmra.mrb[6].mxu0 %vm239_vm0, %v816_v49 }
 0x418   : > { %v1812_v12 = vpop.f32.mrb[4].mxu1 }
 0x419   : > { %v1099_v13 = vadd.f32 %v1812_v12, %v1664_v9  ;;  %v1093_v14 = vpop.f32.mrb[5].mxu1 }
 0x41a   : > { %v1094_v15 = vadd.f32 %v1664_v9, %v1093_v14 }
 0x41c   : > { %v1888_v16 = vpack.c.bf16 %v1099_v13, %v1094_v15 }
 0x41e   : > { %1890 = vmatprep.subr.msk.bf16.mxu0 %vm2201_vm1, %v1888_v16 }
 0x41f   : > { %1893 = vmatpush3.bf16.xpose.msk.msra.mxu0 %vm2201_vm1, %v1888_v16 }
 0x4b4   : > { %v2337_v17 = vpop.f32.mrb[4].mxu0 }
 0x4b5   : > { %v2339_v18 = vpop.f32.mrb[5].mxu0  ;;  %v911_v19 = vsel %vm321_vm3, %v2337_v17, 0.0  ;;  %v917_v25 = vmul.f32 %v2337_v17, %v2337_v17 }
 0x4b6   : > { %912 = vadd.xlane.f32.xlu0 %v911_v19  ;;  %v908_v20 = vsel %vm321_vm3, %v2339_v18, 0.0  ;;  %v916_v21 = vmul.f32 %v2339_v18, %v2339_v18 }
 0x4b7   : > { %v921_v0 = vsel %vm321_vm3, %v917_v25, 0.0 }
 0x4b8   : > { %v918_v24 = vsel %vm321_vm3, %v916_v21, 0.0 }
 0x4ba   : > { %909 = vadd.xlane.f32.xlu0 %v908_v20 }
 0x4bc   : > { %v1801_v22 = vpop.f32.mrb[6].mxu0 }
 0x4bd   : > { %v1014_v23 = vpop.f32.mrb[7].mxu0  ;;  %v1020_v1 = vadd.f32 %v1801_v22, %v1661_v4 }
 0x4be   : > { %v1015_v26 = vadd.f32 %v1661_v4, %v1014_v23  ;;  %919 = vadd.xlane.f32.xlu0 %v918_v24 }
 0x4c0   : > { %1817 = vmatprep.mubr.msk.f32.mxu0 %vm239_vm0, %v1015_v26  ;;  %v468_v26 = vmul.f32 %v2278_v59, %v2278_v59 }
 0x4c1   : > { %1818 = vmatmul.mubr.msk.f32.vlgmr.msra.gmra.mrb[8].mxu0 %vm239_vm0, %v1020_v1 }
 0x4c2   : > { %922 = vadd.xlane.f32.xlu0 %v921_v0  ;;  %v470_v1 = vsel %vm321_vm3, %v468_v26, 0.0  ;;  %v463_v0 = vsel %vm321_vm3, %v2276_v58, 0.0 }
 0x543   : > { %v913_v35 = vpop.xlane.xlu0 %912 }
 0x544   : > { %v915_v43 = vmul.f32 0.0625, %v913_v35 }
 0x546   : > { %v927_v48 = vmul.f32 %v915_v43, %v915_v43  ;;  %v931_v13 = vsub.f32 %v2337_v17, %v915_v43  ;;  %v460_v17 = vsel %vm321_vm3, %v2278_v59, 0.0 }
 0x547   : > { %v910_v36 = vpop.xlane.xlu0 %909 }
 0x548   : > { %v914_v38 = vmul.f32 0.0625, %v910_v36 }
 0x54a   : > { %v926_v41 = vmul.f32 %v914_v38, %v914_v38  ;;  %v930_v5 = vsub.f32 %v2339_v18, %v914_v38 }
 0x54b   : > { %v920_v37 = vpop.xlane.xlu0 %919 }
 0x54c   : > { %v924_v39 = vmul.f32 0.0625, %v920_v37 }
 0x54e   : > { %v928_v44 = vsub.f32 %v924_v39, %v926_v41 }
 0x54f   : > { %v923_v42 = vpop.xlane.xlu0 %922 }
 0x550   : > { %v925_v46 = vmul.f32 0.0625, %v923_v42  ;;  %v932_v49 = vadd.f32 1e-05, %v928_v44 }
 0x552   : > { %v929_v51 = vsub.f32 %v925_v46, %v927_v48  ;;  %1966 = vrsqrt.f32 %v932_v49 }
 0x554   : > { %v933_v57 = vadd.f32 1e-05, %v929_v51 }
 0x55c   : > { %v1967_v3 = vpop.eup %1966 }
 0x55d   : > { %v936_v8 = vmul.f32 %v1967_v3, %v930_v5 }
 0x594   : > { %v1819_v27 = vpop.f32.mrb[8].mxu0 }
 0x595   : > { %v1180_v28 = vpop.f32.mrb[9].mxu0  ;;  %v1192_v29 = vsel %vm321_vm3, %v1819_v27, 0.0  ;;  %v1198_v33 = vmul.f32 %v1819_v27, %v1819_v27 }
 0x596   : > { %1193 = vadd.xlane.f32.xlu1 %v1192_v29  ;;  %v1197_v30 = vmul.f32 %v1180_v28, %v1180_v28  ;;  %v1189_v31 = vsel %vm321_vm3, %v1180_v28, 0.0  ;;  %v235_v29 = vld [vmem:[%s2545_s2] sm:$0xff] }
 0x597   : > { %v1202_v34 = vsel %vm321_vm3, %v1198_v33, 0.0 }
 0x598   : > { %v1199_v32 = vsel %vm321_vm3, %v1197_v30, 0.0  ;;  %v236_v30 = vld [vmem:[%s2545_s2 + $0x8] sm:$0xff] }
 0x59a   : > { %1190 = vadd.xlane.f32.xlu1 %v1189_v31  ;;  %v1894_v31 = vpack.c.bf16 %v236_v30, %v235_v29 }
 0x59c   : > { %1895 = vmatprep.subr.bf16.mxu1 %v1894_v31 }
 0x59d   : > { %1897 = vmatpush3.bf16.msra.mxu1 %v1894_v31 }
 0x59e   : > { %1200 = vadd.xlane.f32.xlu1 %v1199_v32 }
 0x5a2   : > { %1203 = vadd.xlane.f32.xlu1 %v1202_v34 }
 0x623   : > { %v1194_v40 = vpop.xlane.xlu1 %1193 }
 0x624   : > { %v1196_v52 = vmul.f32 0.0625, %v1194_v40 }
 0x626   : > { %v1208_v60 = vmul.f32 %v1196_v52, %v1196_v52  ;;  %v1212_v14 = vsub.f32 %v1819_v27, %v1196_v52  ;;  %v469_v27 = vmul.f32 %v2276_v58, %v2276_v58  ;;  %v237_v52 = vld [vmem:[%s2545_s2 + $0x10] sm:$0xff] }
 0x627   : > { %v1191_v45 = vpop.xlane.xlu1 %1190 }
 0x628   : > { %v1195_v47 = vmul.f32 0.0625, %v1191_v45 }
 0x62a   : > { %v1207_v53 = vmul.f32 %v1195_v47, %v1195_v47  ;;  %v1211_v6 = vsub.f32 %v1180_v28, %v1195_v47  ;;  %v473_v28 = vsel %vm321_vm3, %v469_v27, 0.0 }
 0x62b   : > { %v1201_v50 = vpop.xlane.xlu1 %1200 }
 0x62c   : > { %v1205_v54 = vmul.f32 0.0625, %v1201_v50 }
 0x62e   : > { %v1209_v55 = vsub.f32 %v1205_v54, %v1207_v53  ;;  %v238_v53 = vld [vmem:[%s2545_s2 + $0x18] sm:$0xff] }
 0x62f   : > { %v1204_v56 = vpop.xlane.xlu1 %1203  ;;  %v1898_v54 = vpack.c.bf16 %v238_v53, %v237_v52 }
 0x630   : > { %v1213_v61 = vadd.f32 1e-05, %v1209_v55  ;;  %v1206_v62 = vmul.f32 0.0625, %v1204_v56 }
 0x631   : > { %1899 = vmatprep.subr.bf16.mxu1 %v1898_v54 }
 0x632   : > { %1968 = vrsqrt.f32 %v1213_v61  ;;  %v1210_v63 = vsub.f32 %v1206_v62, %v1208_v60 }
 0x633   : > { %1970 = vrsqrt.f32 %v933_v57 }
 0x634   : > { %v1214_v2 = vadd.f32 1e-05, %v1210_v63 }
 0x636   : > { %1972 = vrsqrt.f32 %v1214_v2 }
 0x63c   : > { %v1969_v7 = vpop.eup %1968 }
 0x63d   : > { %v1217_v9 = vmul.f32 %v1969_v7, %v1211_v6  ;;  %v1971_v12 = vpop.eup %1970 }
 0x63e   : > { %v937_v21 = vmul.f32 %v1971_v12, %v931_v13  ;;  %v325_v12 = vsel %vm321_vm3, %v2223_v10, 0.0  ;;  %v332_v13 = vmul.f32 %v2223_v10, %v2223_v10 }
 0x63f   : > { %v2362_v15 = vadd.f32 %v1217_v9, %v936_v8 }
 0x640   : > { %v1973_v16 = vpop.eup %1972 }
 0x641   : > { %v1221_v19 = vsel %vm321_vm3, %v2362_v15, 0.0  ;;  %v1229_v20 = vmul.f32 %v2362_v15, %v2362_v15  ;;  %v1218_v4 = vmul.f32 %v1973_v16, %v1212_v14  ;;  %v322_v14 = vsel %vm321_vm3, %v2225_v11, 0.0 }
 0x642   : > { %1222 = vadd.xlane.f32.xlu0 %v1221_v19  ;;  %v336_v16 = vsel %vm321_vm3, %v332_v13, 0.0 }
 0x643   : > { %v1220_v18 = vadd.f32 %v1218_v4, %v937_v21  ;;  %v1231_v22 = vsel %vm321_vm3, %v1229_v20, 0.0 }
 0x645   : > { %v1224_v23 = vsel %vm321_vm3, %v1220_v18, 0.0  ;;  %v1230_v24 = vmul.f32 %v1220_v18, %v1220_v18 }
 0x646   : > { %1232 = vadd.xlane.f32.xlu0 %v1231_v22  ;;  %1225 = vadd.xlane.f32.xlu1 %v1224_v23 }
 0x647   : > { %v1234_v25 = vsel %vm321_vm3, %v1230_v24, 0.0 }
 0x64a   : > { %461 = vadd.xlane.f32.xlu0 %v460_v17  ;;  %1235 = vadd.xlane.f32.xlu1 %v1234_v25 }
 0x64e   : > { %471 = vadd.xlane.f32.xlu0 %v470_v1  ;;  %464 = vadd.xlane.f32.xlu1 %v463_v0 }
 0x652   : > { %474 = vadd.xlane.f32.xlu1 %v473_v28 }
 0x6cf   : > { %v1223_v32 = vpop.xlane.xlu0 %1222 }
 0x6d0   : > { %v1227_v33 = vmul.f32 0.0625, %v1223_v32 }
 0x6d2   : > { %v1239_v36 = vmul.f32 %v1227_v33, %v1227_v33  ;;  %v1243_v46 = vsub.f32 %v2362_v15, %v1227_v33 }
 0x6d3   : > { %v1226_v34 = vpop.xlane.xlu1 %1225  ;;  %v1233_v35 = vpop.xlane.xlu0 %1232 }
 0x6d4   : > { %v1228_v37 = vmul.f32 0.0625, %v1226_v34  ;;  %v1237_v38 = vmul.f32 0.0625, %v1233_v35 }
 0x6d6   : > { %v1241_v39 = vsub.f32 %v1237_v38, %v1239_v36  ;;  %v1240_v41 = vmul.f32 %v1228_v37, %v1228_v37  ;;  %v1244_v49 = vsub.f32 %v1220_v18, %v1228_v37 }
 0x6d7   : > { %v1236_v40 = vpop.xlane.xlu1 %1235  ;;  %v462_v21 = vpop.xlane.xlu0 %461 }
 0x6d8   : > { %v1245_v42 = vadd.f32 1e-05, %v1241_v39  ;;  %v1238_v43 = vmul.f32 0.0625, %v1236_v40  ;;  %v466_v23 = vmul.f32 0.0625, %v462_v21 }
 0x6da   : > { %1974 = vrsqrt.f32 %v1245_v42  ;;  %v1242_v44 = vsub.f32 %v1238_v43, %v1240_v41  ;;  %v478_v26 = vmul.f32 %v466_v23, %v466_v23 }
 0x6db   : > { %v465_v20 = vpop.xlane.xlu1 %464  ;;  %v472_v22 = vpop.xlane.xlu0 %471 }
 0x6dc   : > { %v1246_v45 = vadd.f32 1e-05, %v1242_v44  ;;  %v476_v17 = vmul.f32 0.0625, %v472_v22 }
 0x6de   : > { %1976 = vrsqrt.f32 %v1246_v45  ;;  %v480_v29 = vsub.f32 %v476_v17, %v478_v26 }
 0x6df   : > { %v475_v4 = vpop.xlane.xlu1 %474 }
 0x6e0   : > { %v477_v24 = vmul.f32 0.0625, %v475_v4  ;;  %v484_v36 = vadd.f32 1e-05, %v480_v29 }
 0x6e4   : > { %v1975_v47 = vpop.eup %1974 }
 0x6e5   : > { %v1249_v48 = vmul.f32 %v1975_v47, %v1243_v46 }
 0x6e7   : > { %1824 = vmatprep.mubr.msk.f32.mxu1 %vm321_vm3, %v1249_v48 }
 0x6e8   : > { %v1977_v50 = vpop.eup %1976 }
 0x6e9   : > { %v1250_v51 = vmul.f32 %v1977_v50, %v1244_v49 }
 0x6eb   : > { %1825 = vmatmul.mubr.msk.f32.vlgmr.msra.gmra.mrb[6].mxu1 %vm321_vm3, %v1250_v51 }
 0x6ec   : > { %1901 = vmatpush3.bf16.msra.mxu1 %v1898_v54 }
 0x7be   : > { %v1826_v55 = vpop.f32.mrb[6].mxu1 }
 0x7bf   : > { %v1323_v56 = vpop.f32.mrb[7].mxu1  ;;  %v1333_v60 = vmax.f32 %v1826_v55, 0.0 }
 0x7c0   : > { %v1332_v57 = vmax.f32 %v1323_v56, 0.0 }
 0x7c2   : > { %1831 = vmatprep.mubr.msk.f32.mxu1 %vm321_vm3, %v1332_v57 }
 0x7c3   : > { %1832 = vmatmul.mubr.msk.f32.vlgmr.msra.gmra.mrb[8].mxu1 %vm321_vm3, %v1333_v60 }
 0x896   : > { %v1833_v61 = vpop.f32.mrb[8].mxu1 }
 0x897   : > { %v2398_v62 = vadd.f32 %v1833_v61, %v1220_v18  ;;  %v1406_v63 = vpop.f32.mrb[9].mxu1  ;;  %v467_v18 = vmul.f32 0.0625, %v465_v20 }
 0x898   : > { %v2401_v2 = vadd.f32 %v1406_v63, %v2362_v15  ;;  %v331_v15 = vmul.f32 %v2225_v11, %v2225_v11 }
 0x899   : > { %v1418_v3 = vsel %vm321_vm3, %v2398_v62, 0.0  ;;  %v1424_v5 = vmul.f32 %v2398_v62, %v2398_v62  ;;  %v479_v25 = vmul.f32 %v467_v18, %v467_v18  ;;  %v483_v61 = vsub.f32 %v2276_v58, %v467_v18 }
 0x89a   : > { %1419 = vadd.xlane.f32.xlu1 %v1418_v3  ;;  %v1415_v6 = vsel %vm321_vm3, %v2401_v2, 0.0  ;;  %v1423_v7 = vmul.f32 %v2401_v2, %v2401_v2  ;;  %v333_v19 = vsel %vm321_vm3, %v331_v15, 0.0 }
 0x89b   : > { %1416 = vadd.xlane.f32.xlu0 %v1415_v6  ;;  %v1428_v8 = vsel %vm321_vm3, %v1424_v5, 0.0  ;;  %v481_v0 = vsub.f32 %v477_v24, %v479_v25  ;;  %v482_v5 = vsub.f32 %v2278_v59, %v466_v23 }
 0x89c   : > { %v1425_v9 = vsel %vm321_vm3, %v1423_v7, 0.0 }
 0x89d   : > { %v485_v32 = vadd.f32 1e-05, %v481_v0 }
 0x89e   : > { %1429 = vadd.xlane.f32.xlu1 %v1428_v8 }
 0x89f   : > { %1426 = vadd.xlane.f32.xlu0 %v1425_v9  ;;  %1978 = vrsqrt.f32 %v485_v32 }
 0x8a0   : > { %1980 = vrsqrt.f32 %v484_v36 }
 0x8a2   : > { %326 = vadd.xlane.f32.xlu1 %v325_v12 }
 0x8a3   : > { %323 = vadd.xlane.f32.xlu0 %v322_v14 }
 0x8a6   : > { %337 = vadd.xlane.f32.xlu1 %v336_v16 }
 0x8a7   : > { %334 = vadd.xlane.f32.xlu0 %v333_v19 }
 0x8a9   : > { %v1979_v57 = vpop.eup %1978 }
 0x8aa   : > { %v1981_v60 = vpop.eup %1980  ;;  %v489_v8 = vmul.f32 %v1979_v57, %v483_v61 }
 0x8ab   : > { %v488_v12 = vmul.f32 %v1981_v60, %v482_v5 }
 0x927   : > { %v1420_v1 = vpop.xlane.xlu1 %1419 }
 0x928   : > { %v1422_v27 = vmul.f32 0.0625, %v1420_v1  ;;  %v1417_v28 = vpop.xlane.xlu0 %1416 }
 0x929   : > { %v1421_v30 = vmul.f32 0.0625, %v1417_v28 }
 0x92a   : > { %v1434_v33 = vmul.f32 %v1422_v27, %v1422_v27  ;;  %v1438_v63 = vsub.f32 %v2398_v62, %v1422_v27 }
 0x92b   : > { %v1430_v31 = vpop.xlane.xlu1 %1429  ;;  %v1433_v37 = vmul.f32 %v1421_v30, %v1421_v30  ;;  %v1437_v6 = vsub.f32 %v2401_v2, %v1421_v30 }
 0x92c   : > { %v1432_v34 = vmul.f32 0.0625, %v1430_v31  ;;  %v1427_v35 = vpop.xlane.xlu0 %1426 }
 0x92d   : > { %v1431_v38 = vmul.f32 0.0625, %v1427_v35 }
 0x92e   : > { %v1436_v39 = vsub.f32 %v1432_v34, %v1434_v33 }
 0x92f   : > { %v1435_v40 = vsub.f32 %v1431_v38, %v1433_v37  ;;  %v327_v41 = vpop.xlane.xlu1 %326 }
 0x930   : > { %v1440_v42 = vadd.f32 1e-05, %v1436_v39  ;;  %v330_v43 = vmul.f32 0.0625, %v327_v41  ;;  %v324_v44 = vpop.xlane.xlu0 %323 }
 0x931   : > { %v1439_v45 = vadd.f32 1e-05, %v1435_v40  ;;  %v329_v46 = vmul.f32 0.0625, %v324_v44 }
 0x932   : > { %1982 = vrsqrt.f32 %v1440_v42  ;;  %v342_v48 = vmul.f32 %v330_v43, %v330_v43  ;;  %v346_v20 = vsub.f32 %v2223_v10, %v330_v43 }
 0x933   : > { %1984 = vrsqrt.f32 %v1439_v45  ;;  %v338_v47 = vpop.xlane.xlu1 %337  ;;  %v341_v51 = vmul.f32 %v329_v46, %v329_v46  ;;  %v345_v2 = vsub.f32 %v2225_v11, %v329_v46 }
 0x934   : > { %v340_v49 = vmul.f32 0.0625, %v338_v47  ;;  %v335_v50 = vpop.xlane.xlu0 %334 }
 0x935   : > { %v339_v52 = vmul.f32 0.0625, %v335_v50 }
 0x936   : > { %v344_v53 = vsub.f32 %v340_v49, %v342_v48 }
 0x937   : > { %v343_v54 = vsub.f32 %v339_v52, %v341_v51 }
 0x938   : > { %v348_v55 = vadd.f32 1e-05, %v344_v53 }
 0x939   : > { %v347_v56 = vadd.f32 1e-05, %v343_v54 }
 0x93a   : > { %1986 = vrsqrt.f32 %v348_v55 }
 0x93b   : > { %1988 = vrsqrt.f32 %v347_v56 }
 0x93c   : > { %v1983_v3 = vpop.eup %1982 }
 0x93d   : > { %v1985_v7 = vpop.eup %1984  ;;  %v1444_v9 = vmul.f32 %v1983_v3, %v1438_v63 }
 0x93e   : > { %v1443_v13 = vmul.f32 %v1985_v7, %v1437_v6 }
 0x93f   : > { %v1446_v14 = vadd.f32 %v1444_v9, %v489_v8 }
 0x940   : > { %v1445_v15 = vadd.f32 %v1443_v13, %v488_v12 }
 0x941   : > { %v1450_v16 = vsel %vm321_vm3, %v1446_v14, 0.0  ;;  %v1456_v19 = vmul.f32 %v1446_v14, %v1446_v14 }
 0x942   : > { %1451 = vadd.xlane.f32.xlu1 %v1450_v16  ;;  %v1447_v58 = vsel %vm321_vm3, %v1445_v15, 0.0  ;;  %v1455_v62 = vmul.f32 %v1445_v15, %v1445_v15 }
 0x943   : > { %1448 = vadd.xlane.f32.xlu0 %v1447_v58  ;;  %v1460_v4 = vsel %vm321_vm3, %v1456_v19, 0.0 }
 0x944   : > { %v1987_v59 = vpop.eup %1986  ;;  %v1457_v22 = vsel %vm321_vm3, %v1455_v62, 0.0 }
 0x945   : > { %v1989_v21 = vpop.eup %1988  ;;  %v352_v18 = vmul.f32 %v1987_v59, %v346_v20 }
 0x946   : > { %1461 = vadd.xlane.f32.xlu1 %v1460_v4  ;;  %v351_v23 = vmul.f32 %v1989_v21, %v345_v2 }
 0x947   : > { %1458 = vadd.xlane.f32.xlu0 %v1457_v22  ;;  %v354_v24 = vmax.f32 %v352_v18, 0.0 }
 0x948   : > { %v353_v17 = vmax.f32 %v351_v23, 0.0 }
 0x949   : > { %v358_v25 = vsel %vm321_vm3, %v354_v24, -inf }
 0x94a   : > { %359 = vmax.xlane.f32.xlu1 %v358_v25  ;;  %v355_v10 = vsel %vm321_vm3, %v353_v17, -inf }
 0x94b   : > { %356 = vmax.xlane.f32.xlu0 %v355_v10 }
 0x9cf   : > { %v1452_v26 = vpop.xlane.xlu1 %1451 }
 0x9d0   : > { %v1454_v1 = vmul.f32 0.0625, %v1452_v26  ;;  %v1449_v11 = vpop.xlane.xlu0 %1448 }
 0x9d1   : > { %v1453_v0 = vmul.f32 0.0625, %v1449_v11 }
 0x9d2   : > { %v1466_v28 = vmul.f32 %v1454_v1, %v1454_v1  ;;  %v1470_v43 = vsub.f32 %v1446_v14, %v1454_v1 }
 0x9d3   : > { %v1462_v27 = vpop.xlane.xlu1 %1461  ;;  %v1465_v31 = vmul.f32 %v1453_v0, %v1453_v0  ;;  %v1469_v45 = vsub.f32 %v1445_v15, %v1453_v0 }
 0x9d4   : > { %v1464_v29 = vmul.f32 0.0625, %v1462_v27  ;;  %v1459_v30 = vpop.xlane.xlu0 %1458 }
 0x9d5   : > { %v1463_v32 = vmul.f32 0.0625, %v1459_v30 }
 0x9d6   : > { %v1468_v33 = vsub.f32 %v1464_v29, %v1466_v28 }
 0x9d7   : > { %v1467_v34 = vsub.f32 %v1463_v32, %v1465_v31  ;;  %v360_v35 = vpop.xlane.xlu1 %359 }
 0x9d8   : > { %v1472_v36 = vadd.f32 1e-05, %v1468_v33  ;;  %v362_v37 = vsub.f32 %v354_v24, %v360_v35  ;;  %v357_v38 = vpop.xlane.xlu0 %356 }
 0x9d9   : > { %v1471_v39 = vadd.f32 1e-05, %v1467_v34  ;;  %v361_v40 = vsub.f32 %v353_v17, %v357_v38 }
 0x9da   : > { %1990 = vrsqrt.f32 %v1472_v36  ;;  %v365_v41 = vmul.f32 1.442695, %v362_v37 }
 0x9db   : > { %1992 = vrsqrt.f32 %v1471_v39  ;;  %v363_v42 = vmul.f32 1.442695, %v361_v40 }
 0x9dc   : > { %1994 = vpow2.f32 %v365_v41 }
 0x9dd   : > { %1996 = vpow2.f32 %v363_v42 }
 0x9e4   : > { %v1991_v44 = vpop.eup %1990 }
 0x9e5   : > { %v1993_v46 = vpop.eup %1992  ;;  %v1476_v47 = vmul.f32 %v1991_v44, %v1470_v43 }
 0x9e6   : > { %v1475_v48 = vmul.f32 %v1993_v46, %v1469_v45  ;;  %v1995_v52 = vpop.eup %1994 }
 0x9e7   : > { %v1478_v49 = vmax.f32 %v1476_v47, 0.0  ;;  %v1997_v54 = vpop.eup %1996  ;;  %v370_v55 = vsel %vm321_vm3, %v1995_v52, 0.0 }
 0x9e8   : > { %v1477_v50 = vmax.f32 %v1475_v48, 0.0  ;;  %v367_v56 = vsel %vm321_vm3, %v1997_v54, 0.0 }
 0x9e9   : > { %v1482_v51 = vsel %vm321_vm3, %v1478_v49, -inf }
 0x9ea   : > { %1483 = vmax.xlane.f32.xlu1 %v1482_v51  ;;  %v1479_v53 = vsel %vm321_vm3, %v1477_v50, -inf }
 0x9eb   : > { %1480 = vmax.xlane.f32.xlu0 %v1479_v53 }
 0x9ee   : > { %371 = vadd.xlane.f32.xlu1 %v370_v55 }
 0x9ef   : > { %368 = vadd.xlane.f32.xlu0 %v367_v56 }
 0xa77   : > { %v1484_v57 = vpop.xlane.xlu1 %1483 }
 0xa78   : > { %v1486_v60 = vsub.f32 %v1478_v49, %v1484_v57  ;;  %v1481_v61 = vpop.xlane.xlu0 %1480 }
 0xa79   : > { %v1485_v63 = vsub.f32 %v1477_v50, %v1481_v61 }
 0xa7a   : > { %v1489_v3 = vmul.f32 1.442695, %v1486_v60 }
 0xa7b   : > { %v1487_v5 = vmul.f32 1.442695, %v1485_v63  ;;  %v372_v6 = vpop.xlane.xlu1 %371 }
 0xa7c   : > { %1998 = vpow2.f32 %v1489_v3  ;;  %v369_v7 = vpop.xlane.xlu0 %368 }
 0xa7d   : > { %2000 = vpow2.f32 %v1487_v5 }
 0xa7e   : > { %2002 = vrcp.f32 %v372_v6 }
 0xa7f   : > { %2004 = vrcp.f32 %v369_v7 }
 0xa86   : > { %v1999_v8 = vpop.eup %1998 }
 0xa87   : > { %v2001_v9 = vpop.eup %2000  ;;  %v1494_v12 = vsel %vm321_vm3, %v1999_v8, 0.0 }
 0xa88   : > { %v2003_v13 = vpop.eup %2002  ;;  %1495 = vadd.xlane.f32.xlu1 %v1494_v12  ;;  %v1491_v14 = vsel %vm321_vm3, %v2001_v9, 0.0 }
 0xa89   : > { %v2005_v15 = vpop.eup %2004  ;;  %v376_v16 = vmul.f32 %v2003_v13, %v1995_v52  ;;  %1492 = vadd.xlane.f32.xlu0 %v1491_v14 }
 0xa8a   : > { %v375_v19 = vmul.f32 %v2005_v15, %v1997_v54 }
 0xa8b   : > { %378 = vst.msk [vmem:[%s201_s30 + $0x8] sm:$0xff] %vm321_vm3, %v376_v16 }
 0xa8c   : > { %377 = vst.msk [vmem:[%s201_s30] sm:$0xff] %vm321_vm3, %v375_v19 }
 0xa8d   : > { %2023 = shalt.err (!%p2020_p3)
}
 0xa8e   : > { %s2024_s20 = scalar_lea.hbm %s2455_s8, 256  ;;  %s2028_s27 = scalar_lea.hbm %s2547_s4, 512 }
 0xa8f   : > { %p2025_p4 = scmp.ne.s32.totalorder %s2455_s8, %s2024_s20  ;;  %p2029_p9 = scmp.lt.u32.totalorder %s2455_s8, %s2547_s4 }
 0xa90   : > { %p2030_p10 = scmp.lt.u32.totalorder %s2028_s27, %s2024_s20  ;;  %p2032_p12 = scmp.lt.u32.totalorder %s2024_s20, %s2455_s8 }
 0xa91   : > { %p2026_p7 = pnand %p2025_p4, %p2173_p5 }
 0xa92   : > { %p2031_p11 = por %p2030_p10, %p2029_p9 }
 0xa93   : > { %p2027_p8 = pneg %p2026_p7 }
 0xa94   : > { %p2033_p13 = por %p2032_p12, %p2031_p11 }
 0xa96   : > { %p2034_p0 = pnand %p2033_p13, %p2027_p8 }
 0xa98   : > { %2037 = shalt.err (!%p2034_p0)
}
 0xa99   : > { %s2107_s7 = smov 128   ;;  %s2108_s11 = smov 8  }
 0xa9a   : > { %1905 = dma.vmem_to_hbm [thread:$0]  (%p2173_p5), %s2457_s9, 256, %s2455_s8, %s1509_s10, %s2107_s7, %s2107_s7, %s2108_s11  }
 0xa9b   : > { %s194_s12 = scalar_lea.vmem [#allocation2], %s1636_s29  ;;  %s2493_s22 = scalar_lea.hbm %s2546_s3, %s1684_s5 }
 0xa9c   : > { %s1522_s13 = sshll.u32 %s194_s12, 4  ;;  %s1504_s29 = scalar_lea.sflag [#allocation3], %s2440_s28  ;;  %s2495_s13 = int_to_ptr.vmem [resolvable:$true] %s1522_s13 }
 0xa9d   : > { %s2038_s8 = scalar_lea.vmem %s2495_s13, 256  ;;  %s2109_s19 = smov [#allocation2]  }
 0xa9e   : > { %p2039_p1 = scmp.ne.s32.totalorder %s2495_s13, %s2038_s8  ;;  %s2042_s9 = sshll.u32 %s2109_s19, 4  ;;  %s2043_s9 = int_to_ptr.vmem [resolvable:$false] %s2042_s9 }
 0xa9f   : > { %s2044_s5 = scalar_lea.vmem %s2043_s9, 512  ;;  %p2045_p4 = scmp.lt.s32.totalorder %s2495_s13, %s2043_s9 }
 0xaa0   : > { %p2040_p2 = pnand %p2039_p1, %p2173_p5  ;;  %p2046_p7 = scmp.lt.s32.totalorder %s2044_s5, %s2038_s8 }
 0xaa2   : > { %p2041_p3 = pneg %p2040_p2  ;;  %p2047_p8 = por %p2046_p7, %p2045_p4 }
 0xaa4   : > { %p2048_p9 = pnand %p2047_p8, %p2041_p3 }
 0xb15   : > { %v1496_v58 = vpop.xlane.xlu1 %1495 }
 0xb16   : > { %2006 = vrcp.f32 %v1496_v58  ;;  %v1493_v62 = vpop.xlane.xlu0 %1492 }
 0xb17   : > { %2008 = vrcp.f32 %v1493_v62 }
 0xb20   : > { %v2007_v20 = vpop.eup %2006 }
 0xb21   : > { %v2009_v59 = vpop.eup %2008  ;;  %v1500_v2 = vmul.f32 %v2007_v20, %v1999_v8 }
 0xb22   : > { %v1499_v21 = vmul.f32 %v2009_v59, %v2001_v9 }
 0xb23   : > { %1502 = vst.msk [vmem:[%s194_s12 + $0x8] sm:$0xff] %vm321_vm3, %v1500_v2 }
 0xb24   : > { %1501 = vst.msk [vmem:[%s194_s12] sm:$0xff] %vm321_vm3, %v1499_v21 }
 0xb25   : > { %2051 = shalt.err (!%p2048_p9)
}
 0xb26   : > { %s2052_s10 = scalar_lea.hbm %s2493_s22, 256  ;;  %s2056_s30 = scalar_lea.hbm %s2546_s3, 512 }
 0xb27   : > { %p2053_p10 = scmp.ne.s32.totalorder %s2493_s22, %s2052_s10  ;;  %p2057_p13 = scmp.lt.u32.totalorder %s2493_s22, %s2546_s3 }
 0xb28   : > { %p2058_p0 = scmp.lt.u32.totalorder %s2056_s30, %s2052_s10  ;;  %p2060_p2 = scmp.lt.u32.totalorder %s2052_s10, %s2493_s22 }
 0xb29   : > { %p2054_p11 = pnand %p2053_p10, %p2173_p5 }
 0xb2a   : > { %p2059_p1 = por %p2058_p0, %p2057_p13 }
 0xb2b   : > { %p2055_p12 = pneg %p2054_p11 }
 0xb2c   : > { %p2061_p3 = por %p2060_p2, %p2059_p1 }
 0xb2e   : > { %p2062_p4 = pnand %p2061_p3, %p2055_p12 }
 0xb30   : > { %2065 = shalt.err (!%p2062_p4)
}
 0xb31   : > { %1904 = dma.vmem_to_hbm [thread:$0]  (%p2173_p5), %s2495_s13, 256, %s2493_s22, %s1504_s29, %s2107_s7, %s2107_s7, %s2108_s11  }
 0xb32 PF: > { %p1915_p7 = scmp.ge.s32.totalorder %s2104_s18, 2  ;;  %s1553_s14 = sand.u32 1, %s2092_s15  }
 0xb33   : > { %s1554_s20 = scalar_lea.sflag [#allocation3], %s1553_s14 }
 0xb34   : > { %p1909_p8 = pnand %p1915_p7, %p2177_p6 }
 0xb36   : > { %2083 = dma.done.wait (!%p1909_p8), %s1554_s20, 256  }
 0xb37   : > { %2085 = vsyncadd (!%p1909_p8), %s1554_s20, 4294967040  ;;  %s1563_s25 = scalar_lea.sflag [#allocation5], %s1553_s14 }
 0xb38   : > { %2087 = dma.done.wait (!%p1909_p8), %s1563_s25, 256  }
 0xb39   : > { %2089 = vsyncadd (!%p1909_p8), %s1563_s25, 4294967040  ;;  %p18_p5 = scmp.ge.s32.totalorder %s2160_s21, 4   ;;  %s2552_s15 = smov %s2096_s16 }
 0xb3a   : > { %s2553_s16 = smov %s2100_s17  ;;  %s2554_s17 = smov %s2171_s24 }
 0xb3b   : > { %s2555_s18 = smov %s2160_s21  ;;  %20 = sbr.rel (!%p18_p5) target bundleno = 5 (0x5), region = 84 }
 0xb42   :  { %1568 = vsyncpa [#allocation3], 1 }
 0xb43   :  { %1570 = vsyncpa [#allocation3 + $0x1], 1 }
 0xb44   :  { %1571 = vsyncpa [#allocation5], 1 }
 0xb45   :  { %1573 = vsyncpa [#allocation5 + $0x1], 1 }

</bundles_post_ra>
